<compile_context>
chip_gen: v6e
topology: v6e:2x2x1
jax: 0.10.0
libtpu: 0.0.40
codegen_flags: <defaults>
</compile_context>

<pallas_src>
import functools

import jax
import jax.numpy as jnp
from jax.experimental import pallas as pl
from jax.experimental.pallas import tpu as pltpu


# ----------------------------- Pallas kernel ------------------------------ #
def bottleneck_kernel(x_ref, w0_ref, b0_ref, w1_ref, b1_ref, w2_ref, b2_ref,
                      wout_ref, bout_ref, prelu_ref, o_ref, pad_ref,
                      *, H, W, pad, use_proj):
    f32 = jnp.float32
    PREC = jax.lax.Precision.HIGHEST   # tiny K; see precision note above
    HW = H * W
    Cm = w0_ref.shape[0]

    def prelu(v, a):
        return jnp.where(v >= 0, v, a * v)

    # PReLU slopes (SMEM scalars), read once.
    a0 = prelu_ref[0]
    a1 = prelu_ref[1]
    a2 = prelu_ref[2]
    a_out = prelu_ref[3]
    a_proj = prelu_ref[4]

    x = x_ref[...].astype(f32)                                # (Cin, HW)

    # ---- block0: 1x1 conv (+ folded BN) + PReLU — one MXU matmul ----
    b0 = jnp.dot(w0_ref[...], x, preferred_element_type=f32, precision=PREC)
    b0 = prelu(b0 + b0_ref[...], a0)                          # (Cm, HW)

    # ---- block1: 3x3 conv, padding=1 (+ folded BN) + PReLU ----
    # Zero-padded row buffer; each of the 9 taps is a lane-offset slice of it.
    pad_ref[...] = jnp.zeros(pad_ref.shape, f32)
    pad_ref[:, pad:pad + HW] = b0                             # 128-aligned store

    ww = jax.lax.broadcasted_iota(jnp.int32, (1, HW), 1) % W  # in-row column
    acc = jnp.zeros((Cm, HW), f32) + b1_ref[...]
    for k in range(9):                                        # 9 taps, unrolled
        dy, dx = k // 3 - 1, k % 3 - 1
        start = pad + dy * W + dx
        tap = pad_ref[:, start:start + HW]                    # (Cm, HW)
        if dx != 0:                                           # mask row wrap
            tap = jnp.where((ww + dx >= 0) & (ww + dx < W), tap, 0.0)
        acc = acc + jnp.dot(w1_ref[k], tap,
                            preferred_element_type=f32, precision=PREC)
    b1 = prelu(acc, a1)                                       # (Cm, HW)

    # ---- block2: 1x1 conv (+ folded BN) + PReLU ----
    b2 = jnp.dot(w2_ref[...], b1, preferred_element_type=f32, precision=PREC)
    b2 = prelu(b2 + b2_ref[...], a2)                          # (Cout, HW)

    # Dropout: inference-mode identity.
    # TODO(synk): training-mode dropout (pltpu.prng_* mask + 1/(1-p) scale).

    # ---- residual path + output PReLU ----
    if use_proj:   # conv_out = 1x1 conv + BN + PReLU on the block input
        res = jnp.dot(wout_ref[...], x, preferred_element_type=f32,
                      precision=PREC)
        res = prelu(res + bout_ref[...], a_proj)
    else:          # identity residual (requires in_dim == out_dim)
        res = x
    o_ref[...] = prelu(res + b2, a_out).astype(o_ref.dtype)


# ------------------------------ JAX wrapper -------------------------------- #
def run_bottleneck(x, p):
    N, Cin, H, W = x.shape
    HW = H * W
    Cm = p["b0"].shape[0]
    Cout = p["b2"].shape[0]
    use_proj = bool(p["use_proj"])
    if not use_proj:
        assert Cin == Cout, "identity residual requires in_dim == out_dim"

    # Zero pad on each side of the flattened row buffer, rounded up to a lane
    # multiple so the b0 store into the scratch stays 128-lane aligned.
    pad = ((W + 1 + 127) // 128) * 128

    x_flat = x.reshape(N, Cin, HW)                  # spatial onto lanes
    # (co, ci, ky, kx) -> (ky*3 + kx, co, ci): one (Cm, Cm) matrix per tap.
    w1_taps = jnp.transpose(p["w1"], (2, 3, 0, 1)).reshape(9, Cm, Cm)

    vmem = pl.BlockSpec(memory_space=pltpu.MemorySpace.VMEM)
    smem = pl.BlockSpec(memory_space=pltpu.MemorySpace.SMEM)
    kernel = functools.partial(bottleneck_kernel, H=H, W=W, pad=pad,
                               use_proj=use_proj)

    # TODO(synk): for large H*W, additionally tile the spatial axis (with a
    # one-row halo) so the per-step VMEM working set stays bounded on v7x.
    out = pl.pallas_call(
        kernel,
        out_shape=jax.ShapeDtypeStruct((N, Cout, HW), x.dtype),
        grid=(N,),
        in_specs=[
            pl.BlockSpec((None, Cin, HW), lambda n: (n, 0, 0)),  # x (per batch)
            vmem, vmem,            # w0 (Cm, Cin),   b0 (Cm, 1)
            vmem, vmem,            # w1 (9, Cm, Cm), b1 (Cm, 1)
            vmem, vmem,            # w2 (Cout, Cm),  b2 (Cout, 1)
            vmem, vmem,            # wout (Cout, Cin), bout (Cout, 1)
            smem,                  # prelu slopes (5,)
        ],
        out_specs=pl.BlockSpec((None, Cout, HW), lambda n: (n, 0, 0)),
        scratch_shapes=[pltpu.VMEM((Cm, HW + 2 * pad), jnp.float32)],
        compiler_params=pltpu.CompilerParams(
            dimension_semantics=("parallel",)),
    )(
        x_flat,
        p["w0"], p["b0"].reshape(-1, 1),
        w1_taps, p["b1"].reshape(-1, 1),
        p["w2"], p["b2"].reshape(-1, 1),
        p["wout"], p["bout"].reshape(-1, 1),
        p["prelu"],
    )
    return out.reshape(N, Cout, H, W)


# --------------------- deterministic parameter setup ----------------------- #
def _fold_bn(w, b, gamma, beta, mean, var, eps=1e-5):
    scale = gamma / jnp.sqrt(var + eps)
    w_f = w * scale.reshape((-1,) + (1,) * (w.ndim - 1))
    b_f = (b - mean) * scale + beta
    return w_f, b_f


def init_params(key, in_dim, out_dim, projection_factor):
    cm = int(in_dim / projection_factor)

    def conv_bn(k, cin, cout, ksz):
        kw, kb, kg, kbe, km, kv = jax.random.split(k, 6)
        w = 0.2 * jax.random.normal(kw, (cout, cin, ksz, ksz), jnp.float32)
        b = 0.1 * jax.random.normal(kb, (cout,), jnp.float32)
        gamma = 1.0 + 0.1 * jax.random.normal(kg, (cout,), jnp.float32)
        beta = 0.1 * jax.random.normal(kbe, (cout,), jnp.float32)
        mean = 0.05 * jax.random.normal(km, (cout,), jnp.float32)
        var = 1.0 + 0.1 * jnp.abs(jax.random.normal(kv, (cout,), jnp.float32))
        return _fold_bn(w, b, gamma, beta, mean, var)

    k0, k1, k2, k3 = jax.random.split(key, 4)
    w0, b0 = conv_bn(k0, in_dim, cm, 1)
    w1, b1 = conv_bn(k1, cm, cm, 3)
    w2, b2 = conv_bn(k2, cm, out_dim, 1)

    params = {
        "w0": w0[:, :, 0, 0], "b0": b0,
        "w1": w1, "b1": b1,
        "w2": w2[:, :, 0, 0], "b2": b2,
        # PReLU slopes [block0, block1, block2, PReLU_out, conv_out]
        "prelu": jnp.full((5,), 0.25, jnp.float32),
        "use_proj": in_dim > out_dim,
    }
    if in_dim > out_dim:
        wo, bo = conv_bn(k3, in_dim, out_dim, 1)
        params["wout"] = wo[:, :, 0, 0]
        params["bout"] = bo
    else:
        params["wout"] = jnp.zeros((out_dim, in_dim), jnp.float32)
        params["bout"] = jnp.zeros((out_dim,), jnp.float32)
    return params


# --------------------------- pure-JAX reference ---------------------------- #
def ref_forward(x, p):
    HIGH = jax.lax.Precision.HIGHEST

    def prelu(v, a):
        return jnp.where(v >= 0, v, a * v)

    def conv1x1(inp, w, b):
        return jnp.einsum("oi,nihw->nohw", w, inp, precision=HIGH) \
            + b[None, :, None, None]

    def conv3x3(inp, w, b):
        y = jax.lax.conv_general_dilated(
            inp, w, window_strides=(1, 1), padding="SAME",
            dimension_numbers=("NCHW", "OIHW", "NCHW"), precision=HIGH)
        return y + b[None, :, None, None]

    a = p["prelu"]
    b0 = prelu(conv1x1(x, p["w0"], p["b0"]), a[0])
    b1 = prelu(conv3x3(b0, p["w1"], p["b1"]), a[1])
    b2 = prelu(conv1x1(b1, p["w2"], p["b2"]), a[2])
    if p["use_proj"]:
        res = prelu(conv1x1(x, p["wout"], p["bout"]), a[4])
    else:
        res = x
    return prelu(res + b2, a[3])


# ---------------------------------- main ----------------------------------- #
if __name__ == "__main__":
    root = jax.random.PRNGKey(0)
    kx1, kp1, kx2, kp2 = jax.random.split(root, 4)

    # Config A: in_dim > out_dim  -> projection residual (conv_out branch)
    xa = jax.random.normal(kx1, (2, 8, 16, 16), jnp.float32)
    pa = init_params(kp1, in_dim=8, out_dim=4, projection_factor=2)
    ya = jax.block_until_ready(run_bottleneck(xa, pa))
    ra = ref_forward(xa, pa)
    assert ya.shape == (2, 4, 16, 16)
    assert jnp.allclose(ya, ra, atol=2e-3, rtol=2e-3), \
        float(jnp.max(jnp.abs(ya - ra)))

    # Config B: in_dim == out_dim -> identity residual
    xb = jax.random.normal(kx2, (2, 4, 16, 16), jnp.float32)
    pb = init_params(kp2, in_dim=4, out_dim=4, projection_factor=2)
    yb = jax.block_until_ready(run_bottleneck(xb, pb))
    rb = ref_forward(xb, pb)
    assert yb.shape == (2, 4, 16, 16)
    assert jnp.allclose(yb, rb, atol=2e-3, rtol=2e-3), \
        float(jnp.max(jnp.abs(yb - rb)))

    print("KERNEL_OK")
</pallas_src>

<mosaic_0001>
module attributes {stable_mosaic.version = 11 : i64} {
  func.func @bottleneck_kernel(%arg0: i32, %arg1: memref<1x8x256xf32, #tpu.memory_space<vmem>>, %arg2: memref<4x8xf32, #tpu.memory_space<vmem>>, %arg3: memref<4x1xf32, #tpu.memory_space<vmem>>, %arg4: memref<9x4x4xf32, #tpu.memory_space<vmem>>, %arg5: memref<4x1xf32, #tpu.memory_space<vmem>>, %arg6: memref<4x4xf32, #tpu.memory_space<vmem>>, %arg7: memref<4x1xf32, #tpu.memory_space<vmem>>, %arg8: memref<4x8xf32, #tpu.memory_space<vmem>>, %arg9: memref<4x1xf32, #tpu.memory_space<vmem>>, %arg10: memref<5xf32, #tpu.memory_space<smem>>, %arg11: memref<1x4x256xf32, #tpu.memory_space<vmem>>, %arg12: memref<4x512xf32, #tpu.memory_space<vmem>>) attributes {dimension_semantics = [#tpu.dimension_semantics<parallel>], iteration_bounds = array<i64: 2>, scalar_prefetch = 0 : i64, scratch_operands = 1 : i64, tpu.core_type = #tpu.core_type<tc>, window_params = [{transform_indices = @transform_0, window_bounds = array<i64: 1, 8, 256>}, {pipeline_mode = #tpu.pipeline_mode<synchronous>, transform_indices = @transform_1, window_bounds = array<i64: 4, 8>}, {pipeline_mode = #tpu.pipeline_mode<synchronous>, transform_indices = @transform_2, window_bounds = array<i64: 4, 1>}, {pipeline_mode = #tpu.pipeline_mode<synchronous>, transform_indices = @transform_3, window_bounds = array<i64: 9, 4, 4>}, {pipeline_mode = #tpu.pipeline_mode<synchronous>, transform_indices = @transform_4, window_bounds = array<i64: 4, 1>}, {pipeline_mode = #tpu.pipeline_mode<synchronous>, transform_indices = @transform_5, window_bounds = array<i64: 4, 4>}, {pipeline_mode = #tpu.pipeline_mode<synchronous>, transform_indices = @transform_6, window_bounds = array<i64: 4, 1>}, {pipeline_mode = #tpu.pipeline_mode<synchronous>, transform_indices = @transform_7, window_bounds = array<i64: 4, 8>}, {pipeline_mode = #tpu.pipeline_mode<synchronous>, transform_indices = @transform_8, window_bounds = array<i64: 4, 1>}, {transform_indices = @transform_9, window_bounds = array<i64: 5>}, {transform_indices = @transform_10, window_bounds = array<i64: 1, 4, 256>}]} {
    %c0 = arith.constant 0 : index
    %0 = memref.load %arg10[%c0] : memref<5xf32, #tpu.memory_space<smem>>
    %c1 = arith.constant 1 : index
    %1 = memref.load %arg10[%c1] : memref<5xf32, #tpu.memory_space<smem>>
    %c2 = arith.constant 2 : index
    %2 = memref.load %arg10[%c2] : memref<5xf32, #tpu.memory_space<smem>>
    %c3 = arith.constant 3 : index
    %3 = memref.load %arg10[%c3] : memref<5xf32, #tpu.memory_space<smem>>
    %c4 = arith.constant 4 : index
    %4 = memref.load %arg10[%c4] : memref<5xf32, #tpu.memory_space<smem>>
    %c0_0 = arith.constant 0 : index
    %c0_1 = arith.constant 0 : index
    %c0_2 = arith.constant 0 : index
    %5 = vector.load %arg1[%c0_0, %c0_1, %c0_2] : memref<1x8x256xf32, #tpu.memory_space<vmem>>, vector<1x8x256xf32>
    %6 = vector.shape_cast %5 : vector<1x8x256xf32> to vector<8x256xf32>
    %c0_3 = arith.constant 0 : index
    %c0_4 = arith.constant 0 : index
    %7 = vector.load %arg2[%c0_3, %c0_4] : memref<4x8xf32, #tpu.memory_space<vmem>>, vector<4x8xf32>
    %cst = arith.constant dense<0.000000e+00> : vector<4x256xf32>
    %8 = tpu.matmul %7, %6, %cst {dimension_numbers = #tpu.dot_dimension_numbers<[1], [0], [0], [1], [0, 0, 1, 1], [], []>, precision = #tpu.contract_precision<fp32>} : vector<4x8xf32>, vector<8x256xf32>, vector<4x256xf32> -> vector<4x256xf32>
    %c0_5 = arith.constant 0 : index
    %c0_6 = arith.constant 0 : index
    %9 = vector.load %arg3[%c0_5, %c0_6] : memref<4x1xf32, #tpu.memory_space<vmem>>, vector<4x1xf32>
    %10 = vector.broadcast %9 : vector<4x1xf32> to vector<4x256xf32>
    %11 = arith.addf %8, %10 : vector<4x256xf32>
    %cst_7 = arith.constant 0.000000e+00 : f32
    %12 = vector.broadcast %cst_7 : f32 to vector<4x256xf32>
    %13 = arith.cmpf oge, %11, %12 : vector<4x256xf32>
    %14 = vector.broadcast %0 : f32 to vector<4x256xf32>
    %15 = arith.mulf %14, %11 : vector<4x256xf32>
    %16 = arith.select %13, %11, %15 : vector<4x256xi1>, vector<4x256xf32>
    %cst_8 = arith.constant 0.000000e+00 : f32
    %17 = vector.broadcast %cst_8 : f32 to vector<4x512xf32>
    %c0_9 = arith.constant 0 : index
    %c0_10 = arith.constant 0 : index
    %18 = vector.load %arg12[%c0_9, %c0_10] : memref<4x512xf32, #tpu.memory_space<vmem>>, vector<4x512xf32>
    tpu.vector_store %arg12[%c0_9, %c0_10], %17 {strides = array<i32>} : memref<4x512xf32, #tpu.memory_space<vmem>>, vector<4x512xf32>,
    %c0_11 = arith.constant 0 : index
    %c128 = arith.constant 128 : index
    %19 = vector.load %arg12[%c0_11, %c128] : memref<4x512xf32, #tpu.memory_space<vmem>>, vector<4x256xf32>
    tpu.vector_store %arg12[%c0_11, %c128], %16 {strides = array<i32>} : memref<4x512xf32, #tpu.memory_space<vmem>>, vector<4x256xf32>,
    %20 = tpu.iota {dimensions = array<i32: 1>} : vector<1x256xi32>
    %c16_i32 = arith.constant 16 : i32
    %c0_i32 = arith.constant 0 : i32
    %21 = arith.cmpi eq, %c16_i32, %c0_i32 : i32
    %c1_i32 = arith.constant 1 : i32
    %22 = arith.select %21, %c1_i32, %c16_i32 : i32
    %23 = vector.broadcast %22 : i32 to vector<1x256xi32>
    %24 = arith.remsi %20, %23 : vector<1x256xi32>
    %c0_i32_12 = arith.constant 0 : i32
    %25 = vector.broadcast %c0_i32_12 : i32 to vector<1x256xi32>
    %26 = arith.cmpi ne, %24, %25 : vector<1x256xi32>
    %c0_i32_13 = arith.constant 0 : i32
    %27 = vector.broadcast %c0_i32_13 : i32 to vector<1x256xi32>
    %28 = arith.cmpi slt, %24, %27 : vector<1x256xi32>
    %c0_i32_14 = arith.constant 0 : i32
    %29 = arith.cmpi slt, %22, %c0_i32_14 : i32
    %30 = vector.broadcast %29 : i1 to vector<1x256xi1>
    %31 = vector.broadcast %30 : vector<1x256xi1> to vector<1x256xi1>
    %32 = arith.xori %28, %31 : vector<1x256xi1>
    %33 = arith.andi %32, %26 : vector<1x256xi1>
    %34 = vector.broadcast %22 : i32 to vector<1x256xi32>
    %35 = arith.addi %24, %34 : vector<1x256xi32>
    %36 = arith.select %33, %35, %24 : vector<1x256xi1>, vector<1x256xi32>
    %cst_15 = arith.constant 0.000000e+00 : f32
    %37 = vector.broadcast %cst_15 : f32 to vector<4x256xf32>
    %c0_16 = arith.constant 0 : index
    %c0_17 = arith.constant 0 : index
    %38 = vector.load %arg5[%c0_16, %c0_17] : memref<4x1xf32, #tpu.memory_space<vmem>>, vector<4x1xf32>
    %39 = vector.broadcast %38 : vector<4x1xf32> to vector<4x256xf32>
    %40 = arith.addf %37, %39 : vector<4x256xf32>
    %c0_18 = arith.constant 0 : index
    %c111 = arith.constant 111 : index
    %41 = vector.load %arg12[%c0_18, %c111] : memref<4x512xf32, #tpu.memory_space<vmem>>, vector<4x256xf32>
    %c-1_i32 = arith.constant -1 : i32
    %42 = vector.broadcast %c-1_i32 : i32 to vector<1x256xi32>
    %43 = arith.addi %36, %42 : vector<1x256xi32>
    %c0_i32_19 = arith.constant 0 : i32
    %44 = vector.broadcast %c0_i32_19 : i32 to vector<1x256xi32>
    %45 = arith.cmpi sge, %43, %44 : vector<1x256xi32>
    %c-1_i32_20 = arith.constant -1 : i32
    %46 = vector.broadcast %c-1_i32_20 : i32 to vector<1x256xi32>
    %47 = arith.addi %36, %46 : vector<1x256xi32>
    %c16_i32_21 = arith.constant 16 : i32
    %48 = vector.broadcast %c16_i32_21 : i32 to vector<1x256xi32>
    %49 = arith.cmpi slt, %47, %48 : vector<1x256xi32>
    %50 = arith.andi %45, %49 : vector<1x256xi1>
    %cst_22 = arith.constant 0.000000e+00 : f32
    %51 = vector.shape_cast %50 : vector<1x256xi1> to vector<1x256xi1>
    %52 = vector.broadcast %51 : vector<1x256xi1> to vector<4x256xi1>
    %53 = vector.broadcast %cst_22 : f32 to vector<4x256xf32>
    %54 = arith.select %52, %41, %53 : vector<4x256xi1>, vector<4x256xf32>
    %c0_23 = arith.constant 0 : index
    %c0_24 = arith.constant 0 : index
    %c0_25 = arith.constant 0 : index
    %55 = vector.load %arg4[%c0_23, %c0_24, %c0_25] : memref<9x4x4xf32, #tpu.memory_space<vmem>>, vector<1x4x4xf32>
    %56 = vector.shape_cast %55 : vector<1x4x4xf32> to vector<4x4xf32>
    %cst_26 = arith.constant dense<0.000000e+00> : vector<4x256xf32>
    %57 = tpu.matmul %56, %54, %cst_26 {dimension_numbers = #tpu.dot_dimension_numbers<[1], [0], [0], [1], [0, 0, 1, 1], [], []>, precision = #tpu.contract_precision<fp32>} : vector<4x4xf32>, vector<4x256xf32>, vector<4x256xf32> -> vector<4x256xf32>
    %58 = arith.addf %40, %57 : vector<4x256xf32>
    %c0_27 = arith.constant 0 : index
    %c112 = arith.constant 112 : index
    %59 = vector.load %arg12[%c0_27, %c112] : memref<4x512xf32, #tpu.memory_space<vmem>>, vector<4x256xf32>
    %c1_28 = arith.constant 1 : index
    %c0_29 = arith.constant 0 : index
    %c0_30 = arith.constant 0 : index
    %60 = vector.load %arg4[%c1_28, %c0_29, %c0_30] : memref<9x4x4xf32, #tpu.memory_space<vmem>>, vector<1x4x4xf32>
    %61 = vector.shape_cast %60 : vector<1x4x4xf32> to vector<4x4xf32>
    %cst_31 = arith.constant dense<0.000000e+00> : vector<4x256xf32>
    %62 = tpu.matmul %61, %59, %cst_31 {dimension_numbers = #tpu.dot_dimension_numbers<[1], [0], [0], [1], [0, 0, 1, 1], [], []>, precision = #tpu.contract_precision<fp32>} : vector<4x4xf32>, vector<4x256xf32>, vector<4x256xf32> -> vector<4x256xf32>
    %63 = arith.addf %58, %62 : vector<4x256xf32>
    %c0_32 = arith.constant 0 : index
    %c113 = arith.constant 113 : index
    %64 = vector.load %arg12[%c0_32, %c113] : memref<4x512xf32, #tpu.memory_space<vmem>>, vector<4x256xf32>
    %c1_i32_33 = arith.constant 1 : i32
    %65 = vector.broadcast %c1_i32_33 : i32 to vector<1x256xi32>
    %66 = arith.addi %36, %65 : vector<1x256xi32>
    %c0_i32_34 = arith.constant 0 : i32
    %67 = vector.broadcast %c0_i32_34 : i32 to vector<1x256xi32>
    %68 = arith.cmpi sge, %66, %67 : vector<1x256xi32>
    %c1_i32_35 = arith.constant 1 : i32
    %69 = vector.broadcast %c1_i32_35 : i32 to vector<1x256xi32>
    %70 = arith.addi %36, %69 : vector<1x256xi32>
    %c16_i32_36 = arith.constant 16 : i32
    %71 = vector.broadcast %c16_i32_36 : i32 to vector<1x256xi32>
    %72 = arith.cmpi slt, %70, %71 : vector<1x256xi32>
    %73 = arith.andi %68, %72 : vector<1x256xi1>
    %cst_37 = arith.constant 0.000000e+00 : f32
    %74 = vector.shape_cast %73 : vector<1x256xi1> to vector<1x256xi1>
    %75 = vector.broadcast %74 : vector<1x256xi1> to vector<4x256xi1>
    %76 = vector.broadcast %cst_37 : f32 to vector<4x256xf32>
    %77 = arith.select %75, %64, %76 : vector<4x256xi1>, vector<4x256xf32>
    %c2_38 = arith.constant 2 : index
    %c0_39 = arith.constant 0 : index
    %c0_40 = arith.constant 0 : index
    %78 = vector.load %arg4[%c2_38, %c0_39, %c0_40] : memref<9x4x4xf32, #tpu.memory_space<vmem>>, vector<1x4x4xf32>
    %79 = vector.shape_cast %78 : vector<1x4x4xf32> to vector<4x4xf32>
    %cst_41 = arith.constant dense<0.000000e+00> : vector<4x256xf32>
    %80 = tpu.matmul %79, %77, %cst_41 {dimension_numbers = #tpu.dot_dimension_numbers<[1], [0], [0], [1], [0, 0, 1, 1], [], []>, precision = #tpu.contract_precision<fp32>} : vector<4x4xf32>, vector<4x256xf32>, vector<4x256xf32> -> vector<4x256xf32>
    %81 = arith.addf %63, %80 : vector<4x256xf32>
    %c0_42 = arith.constant 0 : index
    %c127 = arith.constant 127 : index
    %82 = vector.load %arg12[%c0_42, %c127] : memref<4x512xf32, #tpu.memory_space<vmem>>, vector<4x256xf32>
    %c-1_i32_43 = arith.constant -1 : i32
    %83 = vector.broadcast %c-1_i32_43 : i32 to vector<1x256xi32>
    %84 = arith.addi %36, %83 : vector<1x256xi32>
    %c0_i32_44 = arith.constant 0 : i32
    %85 = vector.broadcast %c0_i32_44 : i32 to vector<1x256xi32>
    %86 = arith.cmpi sge, %84, %85 : vector<1x256xi32>
    %c-1_i32_45 = arith.constant -1 : i32
    %87 = vector.broadcast %c-1_i32_45 : i32 to vector<1x256xi32>
    %88 = arith.addi %36, %87 : vector<1x256xi32>
    %c16_i32_46 = arith.constant 16 : i32
    %89 = vector.broadcast %c16_i32_46 : i32 to vector<1x256xi32>
    %90 = arith.cmpi slt, %88, %89 : vector<1x256xi32>
    %91 = arith.andi %86, %90 : vector<1x256xi1>
    %cst_47 = arith.constant 0.000000e+00 : f32
    %92 = vector.shape_cast %91 : vector<1x256xi1> to vector<1x256xi1>
    %93 = vector.broadcast %92 : vector<1x256xi1> to vector<4x256xi1>
    %94 = vector.broadcast %cst_47 : f32 to vector<4x256xf32>
    %95 = arith.select %93, %82, %94 : vector<4x256xi1>, vector<4x256xf32>
    %c3_48 = arith.constant 3 : index
    %c0_49 = arith.constant 0 : index
    %c0_50 = arith.constant 0 : index
    %96 = vector.load %arg4[%c3_48, %c0_49, %c0_50] : memref<9x4x4xf32, #tpu.memory_space<vmem>>, vector<1x4x4xf32>
    %97 = vector.shape_cast %96 : vector<1x4x4xf32> to vector<4x4xf32>
    %cst_51 = arith.constant dense<0.000000e+00> : vector<4x256xf32>
    %98 = tpu.matmul %97, %95, %cst_51 {dimension_numbers = #tpu.dot_dimension_numbers<[1], [0], [0], [1], [0, 0, 1, 1], [], []>, precision = #tpu.contract_precision<fp32>} : vector<4x4xf32>, vector<4x256xf32>, vector<4x256xf32> -> vector<4x256xf32>
    %99 = arith.addf %81, %98 : vector<4x256xf32>
    %c0_52 = arith.constant 0 : index
    %c128_53 = arith.constant 128 : index
    %100 = vector.load %arg12[%c0_52, %c128_53] : memref<4x512xf32, #tpu.memory_space<vmem>>, vector<4x256xf32>
    %c4_54 = arith.constant 4 : index
    %c0_55 = arith.constant 0 : index
    %c0_56 = arith.constant 0 : index
    %101 = vector.load %arg4[%c4_54, %c0_55, %c0_56] : memref<9x4x4xf32, #tpu.memory_space<vmem>>, vector<1x4x4xf32>
    %102 = vector.shape_cast %101 : vector<1x4x4xf32> to vector<4x4xf32>
    %cst_57 = arith.constant dense<0.000000e+00> : vector<4x256xf32>
    %103 = tpu.matmul %102, %100, %cst_57 {dimension_numbers = #tpu.dot_dimension_numbers<[1], [0], [0], [1], [0, 0, 1, 1], [], []>, precision = #tpu.contract_precision<fp32>} : vector<4x4xf32>, vector<4x256xf32>, vector<4x256xf32> -> vector<4x256xf32>
    %104 = arith.addf %99, %103 : vector<4x256xf32>
    %c0_58 = arith.constant 0 : index
    %c129 = arith.constant 129 : index
    %105 = vector.load %arg12[%c0_58, %c129] : memref<4x512xf32, #tpu.memory_space<vmem>>, vector<4x256xf32>
    %c1_i32_59 = arith.constant 1 : i32
    %106 = vector.broadcast %c1_i32_59 : i32 to vector<1x256xi32>
    %107 = arith.addi %36, %106 : vector<1x256xi32>
    %c0_i32_60 = arith.constant 0 : i32
    %108 = vector.broadcast %c0_i32_60 : i32 to vector<1x256xi32>
    %109 = arith.cmpi sge, %107, %108 : vector<1x256xi32>
    %c1_i32_61 = arith.constant 1 : i32
    %110 = vector.broadcast %c1_i32_61 : i32 to vector<1x256xi32>
    %111 = arith.addi %36, %110 : vector<1x256xi32>
    %c16_i32_62 = arith.constant 16 : i32
    %112 = vector.broadcast %c16_i32_62 : i32 to vector<1x256xi32>
    %113 = arith.cmpi slt, %111, %112 : vector<1x256xi32>
    %114 = arith.andi %109, %113 : vector<1x256xi1>
    %cst_63 = arith.constant 0.000000e+00 : f32
    %115 = vector.shape_cast %114 : vector<1x256xi1> to vector<1x256xi1>
    %116 = vector.broadcast %115 : vector<1x256xi1> to vector<4x256xi1>
    %117 = vector.broadcast %cst_63 : f32 to vector<4x256xf32>
    %118 = arith.select %116, %105, %117 : vector<4x256xi1>, vector<4x256xf32>
    %c5 = arith.constant 5 : index
    %c0_64 = arith.constant 0 : index
    %c0_65 = arith.constant 0 : index
    %119 = vector.load %arg4[%c5, %c0_64, %c0_65] : memref<9x4x4xf32, #tpu.memory_space<vmem>>, vector<1x4x4xf32>
    %120 = vector.shape_cast %119 : vector<1x4x4xf32> to vector<4x4xf32>
    %cst_66 = arith.constant dense<0.000000e+00> : vector<4x256xf32>
    %121 = tpu.matmul %120, %118, %cst_66 {dimension_numbers = #tpu.dot_dimension_numbers<[1], [0], [0], [1], [0, 0, 1, 1], [], []>, precision = #tpu.contract_precision<fp32>} : vector<4x4xf32>, vector<4x256xf32>, vector<4x256xf32> -> vector<4x256xf32>
    %122 = arith.addf %104, %121 : vector<4x256xf32>
    %c0_67 = arith.constant 0 : index
    %c143 = arith.constant 143 : index
    %123 = vector.load %arg12[%c0_67, %c143] : memref<4x512xf32, #tpu.memory_space<vmem>>, vector<4x256xf32>
    %c-1_i32_68 = arith.constant -1 : i32
    %124 = vector.broadcast %c-1_i32_68 : i32 to vector<1x256xi32>
    %125 = arith.addi %36, %124 : vector<1x256xi32>
    %c0_i32_69 = arith.constant 0 : i32
    %126 = vector.broadcast %c0_i32_69 : i32 to vector<1x256xi32>
    %127 = arith.cmpi sge, %125, %126 : vector<1x256xi32>
    %c-1_i32_70 = arith.constant -1 : i32
    %128 = vector.broadcast %c-1_i32_70 : i32 to vector<1x256xi32>
    %129 = arith.addi %36, %128 : vector<1x256xi32>
    %c16_i32_71 = arith.constant 16 : i32
    %130 = vector.broadcast %c16_i32_71 : i32 to vector<1x256xi32>
    %131 = arith.cmpi slt, %129, %130 : vector<1x256xi32>
    %132 = arith.andi %127, %131 : vector<1x256xi1>
    %cst_72 = arith.constant 0.000000e+00 : f32
    %133 = vector.shape_cast %132 : vector<1x256xi1> to vector<1x256xi1>
    %134 = vector.broadcast %133 : vector<1x256xi1> to vector<4x256xi1>
    %135 = vector.broadcast %cst_72 : f32 to vector<4x256xf32>
    %136 = arith.select %134, %123, %135 : vector<4x256xi1>, vector<4x256xf32>
    %c6 = arith.constant 6 : index
    %c0_73 = arith.constant 0 : index
    %c0_74 = arith.constant 0 : index
    %137 = vector.load %arg4[%c6, %c0_73, %c0_74] : memref<9x4x4xf32, #tpu.memory_space<vmem>>, vector<1x4x4xf32>
    %138 = vector.shape_cast %137 : vector<1x4x4xf32> to vector<4x4xf32>
    %cst_75 = arith.constant dense<0.000000e+00> : vector<4x256xf32>
    %139 = tpu.matmul %138, %136, %cst_75 {dimension_numbers = #tpu.dot_dimension_numbers<[1], [0], [0], [1], [0, 0, 1, 1], [], []>, precision = #tpu.contract_precision<fp32>} : vector<4x4xf32>, vector<4x256xf32>, vector<4x256xf32> -> vector<4x256xf32>
    %140 = arith.addf %122, %139 : vector<4x256xf32>
    %c0_76 = arith.constant 0 : index
    %c144 = arith.constant 144 : index
    %141 = vector.load %arg12[%c0_76, %c144] : memref<4x512xf32, #tpu.memory_space<vmem>>, vector<4x256xf32>
    %c7 = arith.constant 7 : index
    %c0_77 = arith.constant 0 : index
    %c0_78 = arith.constant 0 : index
    %142 = vector.load %arg4[%c7, %c0_77, %c0_78] : memref<9x4x4xf32, #tpu.memory_space<vmem>>, vector<1x4x4xf32>
    %143 = vector.shape_cast %142 : vector<1x4x4xf32> to vector<4x4xf32>
    %cst_79 = arith.constant dense<0.000000e+00> : vector<4x256xf32>
    %144 = tpu.matmul %143, %141, %cst_79 {dimension_numbers = #tpu.dot_dimension_numbers<[1], [0], [0], [1], [0, 0, 1, 1], [], []>, precision = #tpu.contract_precision<fp32>} : vector<4x4xf32>, vector<4x256xf32>, vector<4x256xf32> -> vector<4x256xf32>
    %145 = arith.addf %140, %144 : vector<4x256xf32>
    %c0_80 = arith.constant 0 : index
    %c145 = arith.constant 145 : index
    %146 = vector.load %arg12[%c0_80, %c145] : memref<4x512xf32, #tpu.memory_space<vmem>>, vector<4x256xf32>
    %c1_i32_81 = arith.constant 1 : i32
    %147 = vector.broadcast %c1_i32_81 : i32 to vector<1x256xi32>
    %148 = arith.addi %36, %147 : vector<1x256xi32>
    %c0_i32_82 = arith.constant 0 : i32
    %149 = vector.broadcast %c0_i32_82 : i32 to vector<1x256xi32>
    %150 = arith.cmpi sge, %148, %149 : vector<1x256xi32>
    %c1_i32_83 = arith.constant 1 : i32
    %151 = vector.broadcast %c1_i32_83 : i32 to vector<1x256xi32>
    %152 = arith.addi %36, %151 : vector<1x256xi32>
    %c16_i32_84 = arith.constant 16 : i32
    %153 = vector.broadcast %c16_i32_84 : i32 to vector<1x256xi32>
    %154 = arith.cmpi slt, %152, %153 : vector<1x256xi32>
    %155 = arith.andi %150, %154 : vector<1x256xi1>
    %cst_85 = arith.constant 0.000000e+00 : f32
    %156 = vector.shape_cast %155 : vector<1x256xi1> to vector<1x256xi1>
    %157 = vector.broadcast %156 : vector<1x256xi1> to vector<4x256xi1>
    %158 = vector.broadcast %cst_85 : f32 to vector<4x256xf32>
    %159 = arith.select %157, %146, %158 : vector<4x256xi1>, vector<4x256xf32>
    %c8 = arith.constant 8 : index
    %c0_86 = arith.constant 0 : index
    %c0_87 = arith.constant 0 : index
    %160 = vector.load %arg4[%c8, %c0_86, %c0_87] : memref<9x4x4xf32, #tpu.memory_space<vmem>>, vector<1x4x4xf32>
    %161 = vector.shape_cast %160 : vector<1x4x4xf32> to vector<4x4xf32>
    %cst_88 = arith.constant dense<0.000000e+00> : vector<4x256xf32>
    %162 = tpu.matmul %161, %159, %cst_88 {dimension_numbers = #tpu.dot_dimension_numbers<[1], [0], [0], [1], [0, 0, 1, 1], [], []>, precision = #tpu.contract_precision<fp32>} : vector<4x4xf32>, vector<4x256xf32>, vector<4x256xf32> -> vector<4x256xf32>
    %163 = arith.addf %145, %162 : vector<4x256xf32>
    %cst_89 = arith.constant 0.000000e+00 : f32
    %164 = vector.broadcast %cst_89 : f32 to vector<4x256xf32>
    %165 = arith.cmpf oge, %163, %164 : vector<4x256xf32>
    %166 = vector.broadcast %1 : f32 to vector<4x256xf32>
    %167 = arith.mulf %166, %163 : vector<4x256xf32>
    %168 = arith.select %165, %163, %167 : vector<4x256xi1>, vector<4x256xf32>
    %c0_90 = arith.constant 0 : index
    %c0_91 = arith.constant 0 : index
    %169 = vector.load %arg6[%c0_90, %c0_91] : memref<4x4xf32, #tpu.memory_space<vmem>>, vector<4x4xf32>
    %cst_92 = arith.constant dense<0.000000e+00> : vector<4x256xf32>
    %170 = tpu.matmul %169, %168, %cst_92 {dimension_numbers = #tpu.dot_dimension_numbers<[1], [0], [0], [1], [0, 0, 1, 1], [], []>, precision = #tpu.contract_precision<fp32>} : vector<4x4xf32>, vector<4x256xf32>, vector<4x256xf32> -> vector<4x256xf32>
    %c0_93 = arith.constant 0 : index
    %c0_94 = arith.constant 0 : index
    %171 = vector.load %arg7[%c0_93, %c0_94] : memref<4x1xf32, #tpu.memory_space<vmem>>, vector<4x1xf32>
    %172 = vector.broadcast %171 : vector<4x1xf32> to vector<4x256xf32>
    %173 = arith.addf %170, %172 : vector<4x256xf32>
    %cst_95 = arith.constant 0.000000e+00 : f32
    %174 = vector.broadcast %cst_95 : f32 to vector<4x256xf32>
    %175 = arith.cmpf oge, %173, %174 : vector<4x256xf32>
    %176 = vector.broadcast %2 : f32 to vector<4x256xf32>
    %177 = arith.mulf %176, %173 : vector<4x256xf32>
    %178 = arith.select %175, %173, %177 : vector<4x256xi1>, vector<4x256xf32>
    %c0_96 = arith.constant 0 : index
    %c0_97 = arith.constant 0 : index
    %179 = vector.load %arg8[%c0_96, %c0_97] : memref<4x8xf32, #tpu.memory_space<vmem>>, vector<4x8xf32>
    %cst_98 = arith.constant dense<0.000000e+00> : vector<4x256xf32>
    %180 = tpu.matmul %179, %6, %cst_98 {dimension_numbers = #tpu.dot_dimension_numbers<[1], [0], [0], [1], [0, 0, 1, 1], [], []>, precision = #tpu.contract_precision<fp32>} : vector<4x8xf32>, vector<8x256xf32>, vector<4x256xf32> -> vector<4x256xf32>
    %c0_99 = arith.constant 0 : index
    %c0_100 = arith.constant 0 : index
    %181 = vector.load %arg9[%c0_99, %c0_100] : memref<4x1xf32, #tpu.memory_space<vmem>>, vector<4x1xf32>
    %182 = vector.broadcast %181 : vector<4x1xf32> to vector<4x256xf32>
    %183 = arith.addf %180, %182 : vector<4x256xf32>
    %cst_101 = arith.constant 0.000000e+00 : f32
    %184 = vector.broadcast %cst_101 : f32 to vector<4x256xf32>
    %185 = arith.cmpf oge, %183, %184 : vector<4x256xf32>
    %186 = vector.broadcast %4 : f32 to vector<4x256xf32>
    %187 = arith.mulf %186, %183 : vector<4x256xf32>
    %188 = arith.select %185, %183, %187 : vector<4x256xi1>, vector<4x256xf32>
    %189 = arith.addf %188, %178 : vector<4x256xf32>
    %cst_102 = arith.constant 0.000000e+00 : f32
    %190 = vector.broadcast %cst_102 : f32 to vector<4x256xf32>
    %191 = arith.cmpf oge, %189, %190 : vector<4x256xf32>
    %192 = vector.broadcast %3 : f32 to vector<4x256xf32>
    %193 = arith.mulf %192, %189 : vector<4x256xf32>
    %194 = arith.select %191, %189, %193 : vector<4x256xi1>, vector<4x256xf32>
    %c0_103 = arith.constant 0 : index
    %c0_104 = arith.constant 0 : index
    %c0_105 = arith.constant 0 : index
    %195 = vector.load %arg11[%c0_103, %c0_104, %c0_105] : memref<1x4x256xf32, #tpu.memory_space<vmem>>, vector<1x4x256xf32>
    %196 = vector.shape_cast %195 : vector<1x4x256xf32> to vector<4x256xf32>
    %197 = vector.shape_cast %194 : vector<4x256xf32> to vector<1x4x256xf32>
    tpu.vector_store %arg11[%c0_103, %c0_104, %c0_105], %197 {strides = array<i32>} : memref<1x4x256xf32, #tpu.memory_space<vmem>>, vector<1x4x256xf32>,
    return
  }
  func.func @transform_0(%arg0: i32) -> (i32, i32, i32) {
    %c0_i32 = arith.constant 0 : i32
    %c0_i32_0 = arith.constant 0 : i32
    %c0_i32_1 = arith.constant 0 : i32
    return %arg0, %c0_i32, %c0_i32_0 : i32, i32, i32
  }
  func.func @transform_1(%arg0: i32) -> (i32, i32) {
    %c0_i32 = arith.constant 0 : i32
    %c0_i32_0 = arith.constant 0 : i32
    %c0_i32_1 = arith.constant 0 : i32
    return %c0_i32, %c0_i32_0 : i32, i32
  }
  func.func @transform_2(%arg0: i32) -> (i32, i32) {
    %c0_i32 = arith.constant 0 : i32
    %c0_i32_0 = arith.constant 0 : i32
    %c0_i32_1 = arith.constant 0 : i32
    return %c0_i32, %c0_i32_0 : i32, i32
  }
  func.func @transform_3(%arg0: i32) -> (i32, i32, i32) {
    %c0_i32 = arith.constant 0 : i32
    %c0_i32_0 = arith.constant 0 : i32
    %c0_i32_1 = arith.constant 0 : i32
    %c0_i32_2 = arith.constant 0 : i32
    return %c0_i32, %c0_i32_0, %c0_i32_1 : i32, i32, i32
  }
  func.func @transform_4(%arg0: i32) -> (i32, i32) {
    %c0_i32 = arith.constant 0 : i32
    %c0_i32_0 = arith.constant 0 : i32
    %c0_i32_1 = arith.constant 0 : i32
    return %c0_i32, %c0_i32_0 : i32, i32
  }
  func.func @transform_5(%arg0: i32) -> (i32, i32) {
    %c0_i32 = arith.constant 0 : i32
    %c0_i32_0 = arith.constant 0 : i32
    %c0_i32_1 = arith.constant 0 : i32
    return %c0_i32, %c0_i32_0 : i32, i32
  }
  func.func @transform_6(%arg0: i32) -> (i32, i32) {
    %c0_i32 = arith.constant 0 : i32
    %c0_i32_0 = arith.constant 0 : i32
    %c0_i32_1 = arith.constant 0 : i32
    return %c0_i32, %c0_i32_0 : i32, i32
  }
  func.func @transform_7(%arg0: i32) -> (i32, i32) {
    %c0_i32 = arith.constant 0 : i32
    %c0_i32_0 = arith.constant 0 : i32
    %c0_i32_1 = arith.constant 0 : i32
    return %c0_i32, %c0_i32_0 : i32, i32
  }
  func.func @transform_8(%arg0: i32) -> (i32, i32) {
    %c0_i32 = arith.constant 0 : i32
    %c0_i32_0 = arith.constant 0 : i32
    %c0_i32_1 = arith.constant 0 : i32
    return %c0_i32, %c0_i32_0 : i32, i32
  }
  func.func @transform_9(%arg0: i32) -> i32 {
    %c0_i32 = arith.constant 0 : i32
    %c0_i32_0 = arith.constant 0 : i32
    return %c0_i32 : i32
  }
  func.func @transform_10(%arg0: i32) -> (i32, i32, i32) {
    %c0_i32 = arith.constant 0 : i32
    %c0_i32_0 = arith.constant 0 : i32
    %c0_i32_1 = arith.constant 0 : i32
    return %arg0, %c0_i32, %c0_i32_0 : i32, i32, i32
  }
}

</mosaic_0001>

<bundles_post_ra>
// kernel: tpu_custom_call.1
= control target key start
LH: loop header
LB: loop body
LE: loop exit
PB: predicated region body
PF: predicated region fallthrough
CT: control target
= control target key end

     0   :  { %s7413_s0 = inlined_call_operand.vmem [shape: f32[2,8,256], index: 0, kind: input, shape index: {}]   ;;  %s7414_s1 = inlined_call_operand.vmem [shape: f32[4,8], index: 1, kind: input, shape index: {}]   ;;  %s7415_s2 = inlined_call_operand.vmem [shape: f32[4,1], index: 2, kind: input, shape index: {}]   ;;  %s7416_s3 = inlined_call_operand.vmem [shape: f32[9,4,4], index: 3, kind: input, shape index: {}]   ;;  %s7417_s4 = inlined_call_operand.vmem [shape: f32[4,1], index: 4, kind: input, shape index: {}]   ;;  %s7418_s5 = inlined_call_operand.vmem [shape: f32[4,4], index: 5, kind: input, shape index: {}]   ;;  %s7419_s6 = inlined_call_operand.vmem [shape: f32[4,1], index: 6, kind: input, shape index: {}]   ;;  %s7420_s7 = inlined_call_operand.vmem [shape: f32[4,8], index: 7, kind: input, shape index: {}]   ;;  %s7421_s8 = inlined_call_operand.vmem [shape: f32[4,1], index: 8, kind: input, shape index: {}]   ;;  %s7422_s9 = inlined_call_operand.vmem [shape: f32[5], index: 9, kind: input, shape index: {}]   ;;  %s7423_s10 = inlined_call_operand.hbm [shape: f32[2,4,256], index: 10, kind: output, shape index: {}]  }
   0x1   :  { %7436 = sst [smem:[#allocation23_spill]] %s7413_s0 }
   0x2   :  { %15 = vsyncpa [#allocation5], 0 }
   0x3   :  { %16 = vsyncpa [#allocation4], 0 }
   0x4   :  { %18 = vsyncpa [#allocation4 + $0x1], 0  ;;  %s6680_s13 = smov 0   ;;  %s6682_s14 = smov 0  }
   0x5   :  { %s6684_s15 = smov 0   ;;  %s6686_s16 = smov 0  }
   0x6 LB: > { %s6701_s17 = sadd.s32 4294967295, %s6611_s16   ;;  %s6440_s18 = sadd.s32 4294967294, %s6611_s16   ;;  %s6611_s16 = sphi %s6686_s16, %s7473_s16   ;;  %s6607_s15 = sphi %s6684_s15, %s7472_s15   ;;  %s6603_s14 = sphi %s6682_s14, %s7471_s14   ;;  %s6599_s13 = sphi %s6680_s13, %s7470_s13  }
   0x7   : > { %s6705_s19 = sadd.s32 1, %s6611_s16   ;;  %s246_s20 = sadd.s32 1, %s6607_s15 }
   0x8   : > { %s243_s21 = ssub.s32 %s6611_s16, %s6705_s19  ;;  %p256_p0 = scmp.ne.s32.totalorder %s6607_s15, %s6603_s14 }
   0x9   : > { %p244_p1 = scmp.eq.s32.totalorder %s243_s21, 0  ;;  %p257_p2 = scmp.eq.s32.totalorder %s6701_s17, 1 }
   0xa   : > { %p262_p3 = scmp.ne.s32.totalorder %s6603_s14, %s6599_s13  ;;  %p263_p4 = scmp.eq.s32.totalorder %s6440_s18, 1 }
   0xb   : > { %s6716_s22 = scalar_select %p244_p1, %s6607_s15, %s246_s20  }
   0xc   : > { %p6718_p5 = por %p257_p2, %p256_p0  ;;  %p6722_p6 = por %p263_p4, %p262_p3 }
   0xd   : > { %p6441_p7 = scmp.ge.s32.totalorder %s6611_s16, 1  ;;  %p270_p8 = scmp.lt.s32.totalorder %s6611_s16, 3 }
   0xe   : > { %p6482_p9 = scmp.eq.s32.totalorder %s6701_s17, 0  ;;  %s307_s28 = sshll.u32 %s7422_s9, 4  ;;  %s308_s28 = int_to_ptr.vmem [resolvable:$true] %s307_s28 }
   0xf   : > { %p6729_p10 = pnand %p6441_p7, %p270_p8  ;;  %s6532_s29 = scalar_lea.vmem %s308_s28, 16 }
  0x10   : > { %p6533_p13 = scmp.ne.s32.totalorder %s308_s28, %s6532_s29  ;;  %p6540_p3 = scmp.lt.s32.totalorder %s308_s28, %s308_s28 }
  0x11   : > { %p6474_p11 = pneg %p6729_p10  ;;  %p6541_p4 = scmp.lt.s32.totalorder %s6532_s29, %s6532_s29 }
  0x13   : > { %p6475_p12 = pnand %p6482_p9, %p6474_p11  ;;  %p6542_p7 = por %p6541_p4, %p6540_p3 }
  0x15   : > { %p6534_p0 = pneg %p6475_p12 }
  0x17   : > { %p6535_p1 = pnand %p6534_p0, %p6533_p13 }
  0x19   : > { %p6536_p2 = pneg %p6535_p1 }
  0x1b   : > { %p6543_p8 = pnand %p6542_p7, %p6536_p2 }
  0x1d   : > { %6546 = shalt.err (!%p6543_p8)
}
  0x1e   : > { %s6613_s30 = smov [#allocation3]   ;;  %328 = sbr.rel (%p6729_p10) target bundleno = 969 (0x3c9), region = 60 }
  0x1f   : > { %6477 = dma.vmem_to_smem (!%p6475_p12), %s308_s28, 16, %s6613_s30, [#allocation5]  }
  0x23   : > { %6590 = dma.done.wait (%p6482_p9), [#allocation5], 16  }
  0x24   : > { %6592 = vsyncadd (%p6482_p9), [#allocation5], 4294967280 }
  0x25   : > { %334 = sfence }
  0x26   : > { %p367_p11 = scmp.lt.s32.totalorder %s6701_s17, 1  ;;  %v379_v0 = vld [vmem:[%s7414_s1] sm:$0xf]  ;;  %vm386_vm0 = vcmask 64512   ;;  %v7424_v1 = vmov 0.0   ;;  %v6615_v5 = vmov 0  }
  0x27   : > { %456 = vmatprep.mubr.f32.mxu0 %v7424_v1  ;;  %862 = vst [vmem:[#allocation2] sm:$0xff] %v7424_v1  ;;  %863 = vst [vmem:[#allocation2 + $0x8] sm:$0xff] %v7424_v1  ;;  %v388_v2 = vsel %vm386_vm0, %v379_v0, 0  ;;  %542 = vmatprep.mubr.f32.mxu1 %v7424_v1  ;;  %v380_v3 = vld [vmem:[%s7415_s2] sm:$0xf]  ;;  %s7440_s0 = sld [smem:[#allocation23_spill]] }
  0x28   : > { %s368_s21 = scalar_select %p367_p11, %s6701_s17, 1  ;;  %v457_v4 = vand.u32 4294901760, %v388_v2  ;;  %6528 = vset.pattern.permute.xlu0 %v6615_v5  ;;  %6529 = vset.pattern.permute.xlu1 %v6615_v5  ;;  %v5371_v0 = vld [vmem:[%s7419_s6] sm:$0xf]  ;;  %vm934_vm3 = vcmask 31744   ;;  %vm926_vm4 = vcmask 138240  }
  0x29   : > { %383 = vperm.xlu0 %6528, %v380_v3   ;;  %s372_s29 = sld [smem:[#allocation3]]  ;;  %s6616_s30 = smov 17   ;;  %v869_v3 = vlaneseq  ;;  %v933_v5 = vld [vmem:[%s7416_s3] sm:$0xf]  ;;  %vm938_vm7 = vcmask 1043456   ;;  %vm1425_vm8 = vcmask 130048  }
  0x2a   : > { %s6466_s25 = sshll.u32 %s368_s21, 4  ;;  %v458_v6 = vsub.f32 %v388_v2, %v457_v4  ;;  %s6617_s11 = smov 16   ;;  %v896_v2 = vld [vmem:[%s7417_s4] sm:$0xf]  ;;  %vm1925_vm9 = vcmask 121856   ;;  %vm2421_vm12 = vcmask 7168  }
  0x2b   : > { %s6618_s12 = smov 15   ;;  %s6619_s18 = smov 1   ;;  %vm3396_vm13 = vcmask 1039360   ;;  %vm3892_vm14 = vcmask 924672   ;;  %vm4390_vm15 = vcmask 916480  }
  0x2c   : > { %v459_v9 = vand.u32 4294901760, %v458_v6  ;;  %s6620_s20 = smov 127   ;;  %s6621_s21 = smov 113  }
  0x2d   : > { %s371_s28 = scalar_lea.vmem %s7440_s0, %s6466_s25  ;;  %s6622_s25 = smov 112  }
  0x2e   : > { %v378_v7 = vld [vmem:[%s371_s28 + $0x8] sm:$0xff]  ;;  %v377_v8 = vld [vmem:[%s371_s28] sm:$0xff]  ;;  %v460_v12 = vsub.f32 %v458_v6, %v459_v9  ;;  %s6623_s26 = smov 111   ;;  %s6467_s28 = sshll.u32 %s6701_s17, 7 }
  0x2f   : > { %v6762_v10 = vand.u32 4294901760, %v378_v7  ;;  %v6764_v11 = vand.u32 4294901760, %v377_v8  ;;  %v857_v43 = vstv %s372_s29  ;;  %v3386_v60 = vld [vmem:[#allocation2 + $0xc] sm:$0xf] }
  0x30   : > { %v461_v15 = vand.u32 4294901760, %v460_v12  ;;  %v3882_v61 = vld [vmem:[#allocation2 + $0xc] sm:$0xf] }
  0x31   : > { %7441 = vst [vmem:[#allocation9_spill] sm:$0xff] %v6762_v10  ;;  %7442 = vst [vmem:[#allocation10_spill] sm:$0xff] %v6764_v11  ;;  %421 = vmatprep.subr.mxu0 %v6762_v10  ;;  %v6768_v13 = vsub.f32 %v378_v7, %v6762_v10  ;;  %v6771_v14 = vsub.f32 %v377_v8, %v6764_v11  ;;  %v4378_v62 = vld [vmem:[#allocation2 + $0xc] sm:$0xf] }
  0x32   : > { %423 = vmatpush1.msra.mxu0 %v6764_v11  ;;  %v4868_v63 = vld [vmem:[#allocation2 + $0xc] sm:$0xf] }
  0x33   : > { %7443 = vst [vmem:[#allocation11_spill] sm:$0xff] %v6768_v13  ;;  %7444 = vst [vmem:[#allocation12_spill] sm:$0xff] %v6771_v14  ;;  %v6775_v16 = vand.u32 4294901760, %v6768_v13  ;;  %582 = vmatprep.subr.mxu0 %v6768_v13  ;;  %v6779_v17 = vand.u32 4294901760, %v6771_v14  ;;  %462 = vmatmul.mubr.f32.vlgmr.msra.gmra.mxu0 %v461_v15 }
  0x34   : > { %585 = vmatpush1.msra.mxu0 %v6771_v14  ;;  %618 = vmatprep.mubr.f32.mxu0 %v7424_v1 }
  0x35   : > { %7445 = vst [vmem:[#allocation13_spill] sm:$0xff] %v6775_v16  ;;  %7446 = vst [vmem:[#allocation14_spill] sm:$0xff] %v6779_v17  ;;  %v501_v18 = vsub.f32 %v6768_v13, %v6775_v16  ;;  %v507_v19 = vsub.f32 %v6771_v14, %v6779_v17  ;;  %736 = vmatprep.subr.mxu0 %v6775_v16 }
  0x37   : > { %v6788_v20 = vand.u32 4294901760, %v501_v18  ;;  %v6790_v21 = vand.u32 4294901760, %v507_v19  ;;  %621 = vmatmul.mubr.f32.vlgmr.msra.gmra.mxu0 %v458_v6  ;;  %v936_v6 = vsel %vm934_vm3, %v933_v5, 0  ;;  %v5859_v18 = vld [vmem:[%s7421_s8] sm:$0xf] }
  0x38   : > { %740 = vmatpush1.msra.mxu0 %v6779_v17  ;;  %773 = vmatprep.mubr.f32.mxu0 %v7424_v1  ;;  %v6827_v8 = vand.u32 4294901760, %v936_v6 }
  0x39   : > { %7447 = vst [vmem:[#allocation15_spill] sm:$0xff] %v6788_v20  ;;  %7448 = vst [vmem:[#allocation16_spill] sm:$0xff] %v6790_v21  ;;  %503 = vmatprep.subr.mxu1 %v6788_v20 }
  0x3a   : > { %509 = vmatpush1.msra.mxu1 %v6790_v21  ;;  %v6830_v15 = vsub.f32 %v936_v6, %v6827_v8 }
  0x3b   : > { %544 = vmatmul.mubr.f32.vlgmr.msra.gmra.mxu1 %v457_v4  ;;  %658 = vmatprep.subr.mxu1 %v6762_v10 }
  0x3c   : > { %660 = vmatpush1.msra.mxu1 %v6764_v11  ;;  %693 = vmatprep.mubr.f32.mxu1 %v7424_v1 }
  0x3d   : > { %775 = vmatmul.mubr.f32.vlgmr.msra.gmra.mxu0 %v457_v4  ;;  %812 = vmatprep.subr.mxu1 %v6762_v10 }
  0x3e   : > { %1011 = vmatprep.mubr.f32.mxu0 %v7424_v1 }
  0x3f   : > { %697 = vmatmul.mubr.f32.vlgmr.msra.gmra.mxu1 %v459_v9 }
  0x40   : > { %814 = vmatpush1.msra.mxu1 %v6764_v11  ;;  %847 = vmatprep.mubr.f32.mxu1 %v7424_v1 }
  0x43   : > { %849 = vmatmul.mubr.f32.vlgmr.msra.gmra.mxu1 %v457_v4  ;;  %v870_v4 = vand.u32 127, %v869_v3 }
  0x44   : > { %1097 = vmatprep.mubr.f32.mxu1 %v7424_v1 }
  0x45   : > { %v871_v7 = vadd.s32 128, %v870_v4  ;;  %v876_v12 = vand.u32 15, %v870_v4 }
  0x47   : > { %v883_v9 = vand.u32 15, %v871_v7 }
  0x49   : > { %v6835_v19 = vadd.s32 4294967295, %v883_v9 }
  0x4b   : > { %vm908_vm5 = vcmp.ge.s32.totalorder %v6835_v19, 0 }
  0xa4   : > { %v384_v23 = vpop.permute.xlu0 %383 }
  0xf3   : > { %v463_v22 = vpop.f32.mrf.mxu0 }
  0xf4   : > { %v464_v25 = vadd.f32 %v463_v22, %v384_v23  ;;  %v6453_v22 = vld [vmem:[%s7416_s3 + $0x4] sm:$0xf] }
  0xf5   : > { %v465_v24 = vpop.f32.mrf.mxu0 }
  0xf6   : > { %v466_v29 = vadd.f32 %v465_v24, %v384_v23  ;;  %v6840_v23 = vadd.s32 4294967295, %v876_v12  ;;  %v1014_v24 = vand.u32 4294901760, %v6830_v15 }
  0xf7   : > { %v622_v26 = vpop.f32.mrf.mxu0 }
  0xf8   : > { %vm907_vm6 = vcmp.ge.s32.totalorder %v6840_v23, 0 }
  0xf9   : > { %v624_v28 = vpop.f32.mrf.mxu0 }
  0xfb   : > { %v545_v27 = vpop.f32.mrf.mxu1 }
  0xfc   : > { %v546_v30 = vadd.f32 %v545_v27, %v464_v25 }
  0xfd   : > { %v547_v31 = vpop.f32.mrf.mxu1  ;;  %v776_v35 = vpop.f32.mrf.mxu0 }
  0xfe   : > { %v623_v32 = vadd.f32 %v622_v26, %v546_v30  ;;  %v548_v33 = vadd.f32 %v547_v31, %v466_v29  ;;  %v1429_v26 = vsel %vm934_vm3, %v6453_v22, 0  ;;  %v1015_v29 = vsub.f32 %v6830_v15, %v1014_v24 }
  0xff   : > { %v698_v34 = vpop.f32.mrf.mxu1  ;;  %v778_v41 = vpop.f32.mrf.mxu0 }
 0x100   : > { %v625_v36 = vadd.f32 %v624_v28, %v548_v33  ;;  %v699_v37 = vadd.f32 %v698_v34, %v623_v32  ;;  %v6851_v32 = vand.u32 4294901760, %v1429_v26 }
 0x101   : > { %v700_v38 = vpop.f32.mrf.mxu1 }
 0x102   : > { %v777_v39 = vadd.f32 %v776_v35, %v699_v37  ;;  %v701_v40 = vadd.f32 %v700_v38, %v625_v36 }
 0x103   : > { %v850_v42 = vpop.f32.mrf.mxu1 }
 0x104   : > { %v779_v44 = vadd.f32 %v778_v41, %v701_v40  ;;  %v851_v45 = vadd.f32 %v850_v42, %v777_v39  ;;  %v1016_v39 = vand.u32 4294901760, %v1015_v29 }
 0x105   : > { %v852_v46 = vpop.f32.mrf.mxu1 }
 0x106   : > { %v858_v47 = vmul.f32 %v857_v43, %v851_v45  ;;  %v853_v48 = vadd.f32 %v852_v46, %v779_v44  ;;  %vm855_vm1 = vcmp.ge.f32.partialorder %v851_v45, 0.0 }
 0x108   : > { %vm856_vm2 = vcmp.ge.f32.partialorder %v853_v48, 0.0  ;;  %v859_v49 = vmul.f32 %v857_v43, %v853_v48  ;;  %v860_v50 = vsel %vm855_vm1, %v851_v45, %v858_v47  ;;  %v6864_v43 = vsub.f32 %v1429_v26, %v6851_v32 }
 0x109   : > { %v6867_v45 = vadd.s32 1, %v883_v9  ;;  %vm4878_vm1 = vcmask 908288  }
 0x10a   : > { %v861_v51 = vsel %vm856_vm2, %v853_v48, %v859_v49 }
 0x10b   : > { %v6804_v52 = vcombine.low %v860_v50, %v861_v51  ;;  %v6807_v59 = vcombine.low %v861_v51, %v861_v51  ;;  %v6454_v50 = vld [vmem:[%s7416_s3 + $0x8] sm:$0xf]  ;;  %vm1909_vm10 = vcmp.lt.s32.totalorder %v6867_v45, 16 }
 0x10d   : > { %868 = vst [vmem:[#allocation2 + $0x4] sm:$0xff] %v6804_v52 }
 0x114   : > { %v904_v53 = vld [vmem:[#allocation2 + $0x8] sm:$0xf]  ;;  %v903_v54 = vld [vmem:[#allocation2] sm:$0xff] }
 0x115   : > { %924 = vrot.lane.b32.xlu1 %v904_v53, %s6616_s30  ;;  %v919_v55 = vcombine.high %v903_v54, %v903_v54  ;;  %v1413_v56 = vld [vmem:[#allocation2 + $0x8] sm:$0xf] }
 0x116   : > { %v1903_v57 = vld [vmem:[#allocation2 + $0x8] sm:$0xf] }
 0x117   : > { %922 = vrot.lane.b32.xlu0 %v919_v55, %s6616_s30  ;;  %v2411_v58 = vld [vmem:[#allocation2 + $0x8] sm:$0xf] }
 0x119   : > { %920 = vrot.lane.b32.xlu1 %v903_v54, %s6616_s30 }
 0x11b   : > { %1421 = vrot.lane.b32.xlu0 %v919_v55, %s6617_s11 }
 0x11d   : > { %1423 = vrot.lane.b32.xlu1 %v1413_v56, %s6617_s11 }
 0x11f   : > { %1419 = vrot.lane.b32.xlu0 %v903_v54, %s6617_s11  ;;  %s7316_s11 = sld [smem:[#allocation3 + $0x1]] }
 0x121   : > { %1921 = vrot.lane.b32.xlu1 %v919_v55, %s6618_s12 }
 0x123   : > { %1923 = vrot.lane.b32.xlu0 %v1903_v57, %s6618_s12 }
 0x125   : > { %1919 = vrot.lane.b32.xlu1 %v903_v54, %s6618_s12 }
 0x127   : > { %2417 = vrot.lane.b32.xlu0 %v919_v55, %s6619_s18 }
 0x129   : > { %2419 = vrot.lane.b32.xlu1 %v2411_v58, %s6619_s18 }
 0x12b   : > { %2415 = vrot.lane.b32.xlu0 %v903_v54, %s6619_s18  ;;  %v6878_v54 = vadd.s32 1, %v876_v12  ;;  %s6367_s18 = scalar_lea.hbm %s7423_s10, %s6467_s28 }
 0x12d   : > { %3392 = vrot.lane.b32.xlu1 %v6807_v59, %s6620_s20  ;;  %vm1908_vm11 = vcmp.lt.s32.totalorder %v6878_v54, 16 }
 0x12f   : > { %3394 = vrot.lane.b32.xlu0 %v3386_v60, %s6620_s20  ;;  %v1504_v60 = vand.u32 4294901760, %v6864_v43 }
 0x131   : > { %3390 = vrot.lane.b32.xlu1 %v6804_v52, %s6620_s20  ;;  %s7366_s20 = sld [smem:[#allocation3 + $0x2]] }
 0x133   : > { %3888 = vrot.lane.b32.xlu0 %v6807_v59, %s6621_s21 }
 0x135   : > { %3890 = vrot.lane.b32.xlu1 %v3882_v61, %s6621_s21 }
 0x137   : > { %3886 = vrot.lane.b32.xlu0 %v6804_v52, %s6621_s21  ;;  %s7368_s21 = sld [smem:[#allocation3 + $0x4]] }
 0x139   : > { %4386 = vrot.lane.b32.xlu1 %v6807_v59, %s6622_s25 }
 0x13b   : > { %4388 = vrot.lane.b32.xlu0 %v4378_v62, %s6622_s25 }
 0x13d   : > { %4384 = vrot.lane.b32.xlu1 %v6804_v52, %s6622_s25  ;;  %s7370_s25 = sld [smem:[#allocation3 + $0x3]] }
 0x13f   : > { %4874 = vrot.lane.b32.xlu0 %v6807_v59, %s6623_s26 }
 0x141   : > { %4876 = vrot.lane.b32.xlu1 %v4868_v63, %s6623_s26  ;;  %v1935_v63 = vsel %vm934_vm3, %v6454_v50, 0 }
 0x142   : > { %v6899_v22 = vand.u32 4294901760, %v1935_v63 }
 0x143   : > { %4872 = vrot.lane.b32.xlu0 %v6804_v52, %s6623_s26  ;;  %s364_s26 = sand.u32 1, %s6603_s14  }
 0x144   : > { %s6446_s27 = sshll.u32 %s364_s26, 3 }
 0x145   : > { %899 = vperm.xlu1 %6529, %v896_v2   ;;  %s366_s29 = scalar_lea.vmem [#allocation6], %s6446_s27 }
 0x146   : > { %s6369_s30 = sshll.u32 %s366_s29, 4  ;;  %s6370_s30 = int_to_ptr.vmem [resolvable:$true] %s6369_s30 }
 0x147   : > { %5374 = vperm.xlu0 %6528, %v5371_v0  }
 0x149   : > { %5862 = vperm.xlu1 %6529, %v5859_v18   ;;  %v1505_v18 = vsub.f32 %v6864_v43, %v1504_v60 }
 0x187   : > { %v925_v25 = vpop.permute.xlu1 %924 }
 0x189   : > { %v923_v27 = vpop.permute.xlu0 %922 }
 0x18a   : > { %v928_v28 = vsel %vm926_vm4, %v923_v27, %v925_v25 }
 0x18b   : > { %v932_v30 = vsel %vm908_vm5, %v928_v28, 0.0  ;;  %v921_v31 = vpop.permute.xlu1 %920 }
 0x18c   : > { %v943_v33 = vsel %vm938_vm7, %v932_v30, 0  ;;  %v927_v34 = vsel %vm926_vm4, %v921_v31, %v923_v27 }
 0x18d   : > { %v6854_v35 = vand.u32 4294901760, %v943_v33  ;;  %v931_v36 = vsel %vm907_vm6, %v927_v34, 0.0  ;;  %v1422_v37 = vpop.permute.xlu0 %1421 }
 0x18e   : > { %v940_v38 = vsel %vm938_vm7, %v931_v36, 0  ;;  %v1506_v36 = vand.u32 4294901760, %v1505_v18 }
 0x18f   : > { %v6859_v40 = vand.u32 4294901760, %v940_v38  ;;  %v1424_v41 = vpop.permute.xlu1 %1423  ;;  %976 = vmatprep.subr.mxu0 %v6854_v35  ;;  %v1054_v42 = vsub.f32 %v943_v33, %v6854_v35 }
 0x190   : > { %v1427_v44 = vsel %vm1425_vm8, %v1422_v37, %v1424_v41 }
 0x191   : > { %v1060_v46 = vsub.f32 %v940_v38, %v6859_v40  ;;  %v1433_v47 = vsel %vm938_vm7, %v1427_v44, 0  ;;  %978 = vmatpush1.msra.mxu0 %v6859_v40  ;;  %v1420_v48 = vpop.permute.xlu0 %1419  ;;  %v1055_v49 = vand.u32 4294901760, %v1054_v42  ;;  %v6455_v44 = vld [vmem:[%s7416_s3 + $0xc] sm:$0xf] }
 0x192   : > { %v6875_v51 = vand.u32 4294901760, %v1433_v47  ;;  %v1426_v53 = vsel %vm1425_vm8, %v1420_v48, %v1422_v37  ;;  %1017 = vmatmul.mubr.f32.vlgmr.msra.gmra.mxu0 %v1016_v39  ;;  %1137 = vmatprep.subr.mxu0 %v1054_v42  ;;  %v6916_v37 = vsub.f32 %v1935_v63, %v6899_v22  ;;  %v2431_v50 = vsel %vm934_vm3, %v6455_v44, 0 }
 0x193   : > { %v1431_v55 = vsel %vm938_vm7, %v1426_v53, 0  ;;  %v1922_v56 = vpop.permute.xlu1 %1921  ;;  %1140 = vmatpush1.msra.mxu0 %v1060_v46  ;;  %1173 = vmatprep.mubr.f32.mxu0 %v7424_v1  ;;  %v1061_v57 = vand.u32 4294901760, %v1060_v46  ;;  %v1056_v58 = vsub.f32 %v1054_v42, %v1055_v49 }
 0x194   : > { %v1544_v61 = vsub.f32 %v1433_v47, %v6875_v51  ;;  %v6884_v62 = vand.u32 4294901760, %v1431_v55  ;;  %1291 = vmatprep.subr.mxu0 %v1055_v49  ;;  %v2012_v47 = vand.u32 4294901760, %v6916_v37 }
 0x195   : > { %v1924_v0 = vpop.permute.xlu0 %1923  ;;  %v1057_v2 = vand.u32 4294901760, %v1056_v58  ;;  %v1062_v3 = vsub.f32 %v1060_v46, %v1061_v57 }
 0x196   : > { %v6889_v4 = vsub.f32 %v1431_v55, %v6884_v62  ;;  %v1927_v5 = vsel %vm1925_vm9, %v1922_v56, %v1924_v0  ;;  %1176 = vmatmul.mubr.f32.vlgmr.msra.gmra.mxu0 %v6830_v15  ;;  %v1545_v6 = vand.u32 4294901760, %v1544_v61 }
 0x197   : > { %v1931_v7 = vsel %vm1909_vm10, %v1927_v5, 0.0  ;;  %1295 = vmatpush1.msra.mxu0 %v1061_v57  ;;  %v1920_v9 = vpop.permute.xlu1 %1919  ;;  %1058 = vmatprep.subr.mxu1 %v1057_v2  ;;  %v1063_v12 = vand.u32 4294901760, %v1062_v3  ;;  %v6950_v57 = vand.u32 4294901760, %v2431_v50  ;;  %v6456_v5 = vld [vmem:[%s7416_s3 + $0x10] sm:$0xf] }
 0x198   : > { %v1941_v25 = vsel %vm938_vm7, %v1931_v7, 0  ;;  %v1926_v26 = vsel %vm1925_vm9, %v1920_v9, %v1922_v56  ;;  %1466 = vmatprep.subr.mxu0 %v6875_v51  ;;  %1328 = vmatprep.mubr.f32.mxu0 %v7424_v1  ;;  %v1551_v27 = vand.u32 4294901760, %v6889_v4  ;;  %v1546_v33 = vsub.f32 %v1544_v61, %v1545_v6 }
 0x199   : > { %v1930_v28 = vsel %vm1908_vm11, %v1926_v26, 0.0  ;;  %1064 = vmatpush1.msra.mxu1 %v1063_v12  ;;  %v2418_v29 = vpop.permute.xlu0 %2417  ;;  %v6908_v30 = vand.u32 4294901760, %v1941_v25  ;;  %v2013_v56 = vsub.f32 %v6916_v37, %v2012_v47  ;;  %v6963_v2 = vsub.f32 %v2431_v50, %v6950_v57 }
 0x19a   : > { %v1938_v31 = vsel %vm938_vm7, %v1930_v28, 0  ;;  %1099 = vmatmul.mubr.f32.vlgmr.msra.gmra.mxu1 %v6827_v8  ;;  %1213 = vmatprep.subr.mxu1 %v6854_v35  ;;  %v1552_v42 = vsub.f32 %v6889_v4, %v1551_v27  ;;  %v2912_v9 = vsel %vm934_vm3, %v6456_v5, 0 }
 0x19b   : > { %1330 = vmatmul.mubr.f32.vlgmr.msra.gmra.mxu0 %v6827_v8  ;;  %v2420_v34 = vpop.permute.xlu1 %2419  ;;  %1215 = vmatpush1.msra.mxu1 %v6859_v40  ;;  %v6920_v38 = vand.u32 4294901760, %v1938_v31  ;;  %v2052_v46 = vsub.f32 %v1941_v25, %v6908_v30  ;;  %v2014_v0 = vand.u32 4294901760, %v2013_v56  ;;  %v2916_v25 = vsel %vm938_vm7, %v6807_v59, 0 }
 0x19c   : > { %1468 = vmatpush1.msra.mxu0 %v6884_v62  ;;  %1367 = vmatprep.subr.mxu1 %v6854_v35  ;;  %v2423_v39 = vsel %vm2421_vm12, %v2418_v29, %v2420_v34  ;;  %v1547_v35 = vand.u32 4294901760, %v1546_v33  ;;  %v6992_v26 = vand.u32 4294901760, %v2912_v9  ;;  %v2914_v59 = vsel %vm938_vm7, %v6804_v52, 0 }
 0x19d   : > { %1627 = vmatprep.subr.mxu0 %v1544_v61  ;;  %1248 = vmatprep.mubr.f32.mxu1 %v7424_v1  ;;  %v2416_v41 = vpop.permute.xlu0 %2415  ;;  %v2427_v48 = vsel %vm908_vm5, %v2423_v39, 0.0  ;;  %v2058_v15 = vsub.f32 %v1938_v31, %v6920_v38  ;;  %v7014_v39 = vand.u32 4294901760, %v2914_v59 }
 0x19e   : > { %1501 = vmatprep.mubr.f32.mxu0 %v7424_v1  ;;  %1252 = vmatmul.mubr.f32.vlgmr.msra.gmra.mxu1 %v1014_v24  ;;  %v2422_v49 = vsel %vm2421_vm12, %v2416_v41, %v2418_v29  ;;  %v1553_v24 = vand.u32 4294901760, %v1552_v42  ;;  %v2437_v53 = vsel %vm938_vm7, %v2427_v48, 0  ;;  %v7000_v29 = vand.u32 4294901760, %v2916_v25  ;;  %v6457_v41 = vld [vmem:[%s7416_s3 + $0x14] sm:$0xf] }
 0x19f   : > { %1369 = vmatpush1.msra.mxu1 %v6859_v40  ;;  %1507 = vmatmul.mubr.f32.vlgmr.msra.gmra.mxu0 %v1506_v36  ;;  %v2053_v40 = vand.u32 4294901760, %v2052_v46  ;;  %v2426_v55 = vsel %vm907_vm6, %v2422_v49, 0.0  ;;  %v2059_v58 = vand.u32 4294901760, %v2058_v15  ;;  %v7007_v33 = vsub.f32 %v2912_v9, %v6992_v26 }
 0x1a0   : > { %1630 = vmatpush1.msra.mxu0 %v6889_v4  ;;  %1548 = vmatprep.subr.mxu1 %v1547_v35  ;;  %v2434_v61 = vsel %vm938_vm7, %v2426_v55, 0  ;;  %v3027_v42 = vsub.f32 %v2916_v25, %v7000_v29  ;;  %v3406_v48 = vsel %vm934_vm3, %v6457_v41, 0 }
 0x1a1   : > { %1781 = vmatprep.subr.mxu0 %v1545_v6  ;;  %1402 = vmatprep.mubr.f32.mxu1 %v7424_v1  ;;  %v2054_v63 = vsub.f32 %v2052_v46, %v2053_v40  ;;  %v6967_v3 = vand.u32 4294901760, %v2434_v61  ;;  %v2060_v4 = vsub.f32 %v2058_v15, %v2059_v58  ;;  %v2987_v44 = vand.u32 4294901760, %v7007_v33 }
 0x1a2   : > { %1663 = vmatprep.mubr.f32.mxu0 %v7424_v1  ;;  %1404 = vmatmul.mubr.f32.vlgmr.msra.gmra.mxu1 %v6827_v8  ;;  %v6955_v8 = vand.u32 4294901760, %v2437_v53 }
 0x1a3   : > { %1554 = vmatpush1.msra.mxu1 %v1553_v24  ;;  %1666 = vmatmul.mubr.f32.vlgmr.msra.gmra.mxu0 %v6864_v43  ;;  %v2055_v6 = vand.u32 4294901760, %v2054_v63  ;;  %v6981_v12 = vsub.f32 %v2434_v61, %v6967_v3  ;;  %v2061_v43 = vand.u32 4294901760, %v2060_v4  ;;  %v2988_v24 = vsub.f32 %v7007_v33, %v2987_v44 }
 0x1a4   : > { %1785 = vmatpush1.msra.mxu0 %v1551_v27  ;;  %1703 = vmatprep.subr.mxu1 %v6875_v51  ;;  %v2548_v7 = vsub.f32 %v2437_v53, %v6955_v8 }
 0x1a5   : > { %1974 = vmatprep.subr.mxu0 %v6908_v30  ;;  %1587 = vmatprep.mubr.f32.mxu1 %v7424_v1  ;;  %v2555_v27 = vand.u32 4294901760, %v6981_v12  ;;  %v2989_v61 = vand.u32 4294901760, %v2988_v24 }
 0x1a6   : > { %1818 = vmatprep.mubr.f32.mxu0 %v7424_v1  ;;  %1589 = vmatmul.mubr.f32.vlgmr.msra.gmra.mxu1 %v6851_v32 }
 0x1a7   : > { %1705 = vmatpush1.msra.mxu1 %v6884_v62  ;;  %1820 = vmatmul.mubr.f32.vlgmr.msra.gmra.mxu0 %v6851_v32  ;;  %v2556_v52 = vsub.f32 %v6981_v12, %v2555_v27 }
 0x1a8   : > { %1976 = vmatpush1.msra.mxu0 %v6920_v38  ;;  %1857 = vmatprep.subr.mxu1 %v6875_v51  ;;  %v2508_v51 = vand.u32 4294901760, %v6963_v2 }
 0x1a9   : > { %2135 = vmatprep.subr.mxu0 %v2052_v46  ;;  %1738 = vmatprep.mubr.f32.mxu1 %v7424_v1 }
 0x1aa   : > { %2009 = vmatprep.mubr.f32.mxu0 %v7424_v1  ;;  %1742 = vmatmul.mubr.f32.vlgmr.msra.gmra.mxu1 %v1504_v60  ;;  %v2549_v60 = vand.u32 4294901760, %v2548_v7  ;;  %v2509_v18 = vsub.f32 %v6963_v2, %v2508_v51 }
 0x1ab   : > { %1859 = vmatpush1.msra.mxu1 %v6884_v62  ;;  %2015 = vmatmul.mubr.f32.vlgmr.msra.gmra.mxu0 %v2014_v0  ;;  %v3393_v62 = vpop.permute.xlu1 %3392 }
 0x1ac   : > { %2138 = vmatpush1.msra.mxu0 %v2058_v15  ;;  %2056 = vmatprep.subr.mxu1 %v2055_v6  ;;  %v2550_v28 = vsub.f32 %v2548_v7, %v2549_v60  ;;  %v2510_v31 = vand.u32 4294901760, %v2509_v18 }
 0x1ad   : > { %2289 = vmatprep.subr.mxu0 %v2053_v40  ;;  %1892 = vmatprep.mubr.f32.mxu1 %v7424_v1  ;;  %v7041_v40 = vand.u32 4294901760, %v3406_v48 }
 0x1ae   : > { %2171 = vmatprep.mubr.f32.mxu0 %v7424_v1  ;;  %1894 = vmatmul.mubr.f32.vlgmr.msra.gmra.mxu1 %v6851_v32  ;;  %v3395_v32 = vpop.permute.xlu0 %3394 }
 0x1af   : > { %2062 = vmatpush1.msra.mxu1 %v2061_v43  ;;  %2174 = vmatmul.mubr.f32.vlgmr.msra.gmra.mxu0 %v6916_v37  ;;  %v3398_v34 = vsel %vm3396_vm13, %v3393_v62, %v3395_v32  ;;  %v3391_v36 = vpop.permute.xlu1 %3390  ;;  %v2557_v37 = vand.u32 4294901760, %v2556_v52  ;;  %v7054_v63 = vsub.f32 %v3406_v48, %v7041_v40 }
 0x1b0   : > { %2293 = vmatpush1.msra.mxu0 %v2059_v58  ;;  %2211 = vmatprep.subr.mxu1 %v6908_v30  ;;  %v3402_v35 = vsel %vm1909_vm10, %v3398_v34, 0.0  ;;  %v3397_v46 = vsel %vm3396_vm13, %v3391_v36, %v3393_v62 }
 0x1b1   : > { %2470 = vmatprep.subr.mxu0 %v6955_v8  ;;  %2095 = vmatprep.mubr.f32.mxu1 %v7424_v1  ;;  %v3412_v49 = vsel %vm938_vm7, %v3402_v35, 0  ;;  %v3401_v50 = vsel %vm1908_vm11, %v3397_v46, 0.0 }
 0x1b2   : > { %2326 = vmatprep.mubr.f32.mxu0 %v7424_v1  ;;  %2097 = vmatmul.mubr.f32.vlgmr.msra.gmra.mxu1 %v6899_v22  ;;  %v3889_v15 = vpop.permute.xlu0 %3888  ;;  %v7046_v53 = vand.u32 4294901760, %v3412_v49  ;;  %v3409_v55 = vsel %vm938_vm7, %v3401_v50, 0 }
 0x1b3   : > { %2213 = vmatpush1.msra.mxu1 %v6920_v38  ;;  %2328 = vmatmul.mubr.f32.vlgmr.msra.gmra.mxu0 %v6899_v22  ;;  %v3891_v56 = vpop.permute.xlu1 %3890  ;;  %v7058_v0 = vand.u32 4294901760, %v3409_v55 }
 0x1b4   : > { %2472 = vmatpush1.msra.mxu0 %v6967_v3  ;;  %2365 = vmatprep.subr.mxu1 %v6908_v30  ;;  %v2551_v30 = vand.u32 4294901760, %v2550_v28  ;;  %v3894_v4 = vsel %vm3892_vm14, %v3889_v15, %v3891_v56 }
 0x1b5   : > { %2631 = vmatprep.subr.mxu0 %v2548_v7  ;;  %2246 = vmatprep.mubr.f32.mxu1 %v7424_v1  ;;  %v6458_v7 = vld [vmem:[%s7416_s3 + $0x18] sm:$0xf]  ;;  %v3898_v43 = vsel %vm908_vm5, %v3894_v4, 0.0 }
 0x1b6   : > { %2505 = vmatprep.mubr.f32.mxu0 %v7424_v1  ;;  %2250 = vmatmul.mubr.f32.vlgmr.msra.gmra.mxu1 %v2012_v47  ;;  %v3033_v47 = vsub.f32 %v2914_v59, %v7014_v39  ;;  %v3887_v5 = vpop.permute.xlu0 %3886  ;;  %v3902_v62 = vsel %vm934_vm3, %v6458_v7, 0  ;;  %v3908_v19 = vsel %vm938_vm7, %v3898_v43, 0 }
 0x1b7   : > { %2367 = vmatpush1.msra.mxu1 %v6920_v38  ;;  %2511 = vmatmul.mubr.f32.vlgmr.msra.gmra.mxu0 %v2510_v31  ;;  %v3028_v38 = vand.u32 4294901760, %v3027_v42  ;;  %v7094_v23 = vand.u32 4294901760, %v3908_v19  ;;  %v4387_v28 = vpop.permute.xlu1 %4386 }
 0x1b8   : > { %2634 = vmatpush1.msra.mxu0 %v6981_v12  ;;  %2552 = vmatprep.subr.mxu1 %v2551_v30  ;;  %v3483_v12 = vand.u32 4294901760, %v7054_v63  ;;  %v6459_v30 = vld [vmem:[%s7416_s3 + $0x1c] sm:$0xf] }
 0x1b9   : > { %2785 = vmatprep.subr.mxu0 %v2549_v60  ;;  %2400 = vmatprep.mubr.f32.mxu1 %v7424_v1  ;;  %v3029_v58 = vsub.f32 %v3027_v42, %v3028_v38  ;;  %v3893_v60 = vsel %vm3892_vm14, %v3887_v5, %v3889_v15 }
 0x1ba   : > { %2667 = vmatprep.mubr.f32.mxu0 %v7424_v1  ;;  %2402 = vmatmul.mubr.f32.vlgmr.msra.gmra.mxu1 %v6899_v22  ;;  %v3034_v22 = vand.u32 4294901760, %v3033_v47  ;;  %v3897_v18 = vsel %vm907_vm6, %v3893_v60, 0.0  ;;  %v3484_v25 = vsub.f32 %v7054_v63, %v3483_v12  ;;  %v4389_v52 = vpop.permute.xlu0 %4388 }
 0x1bb   : > { %2558 = vmatpush1.msra.mxu1 %v2557_v37  ;;  %2670 = vmatmul.mubr.f32.vlgmr.msra.gmra.mxu0 %v6963_v2  ;;  %v3030_v9 = vand.u32 4294901760, %v3029_v58  ;;  %v7076_v2 = vsub.f32 %v3409_v55, %v7058_v0  ;;  %v3905_v32 = vsel %vm938_vm7, %v3897_v18, 0  ;;  %v4392_v46 = vsel %vm4390_vm15, %v4387_v28, %v4389_v52  ;;  %v4385_v48 = vpop.permute.xlu1 %4384 }
 0x1bc   : > { %2789 = vmatpush1.msra.mxu0 %v2555_v27  ;;  %2707 = vmatprep.subr.mxu1 %v6955_v8  ;;  %v3035_v6 = vsub.f32 %v3033_v47, %v3034_v22  ;;  %v7088_v27 = vand.u32 4294901760, %v3902_v62  ;;  %v3485_v31 = vand.u32 4294901760, %v3484_v25  ;;  %v7106_v36 = vand.u32 4294901760, %v3905_v32 }
 0x1bd   : > { %2949 = vmatprep.subr.mxu0 %v7000_v29  ;;  %2591 = vmatprep.mubr.f32.mxu1 %v7424_v1  ;;  %v4394_v37 = vsel %vm934_vm3, %v6459_v30, 0 }
 0x1be   : > { %2822 = vmatprep.mubr.f32.mxu0 %v7424_v1  ;;  %2593 = vmatmul.mubr.f32.vlgmr.msra.gmra.mxu1 %v6950_v57  ;;  %v7102_v34 = vsub.f32 %v3902_v62, %v7088_v27  ;;  %v7134_v15 = vand.u32 4294901760, %v4394_v37 }
 0x1bf   : > { %2709 = vmatpush1.msra.mxu1 %v6967_v3  ;;  %2824 = vmatmul.mubr.f32.vlgmr.msra.gmra.mxu0 %v6950_v57  ;;  %v4877_v55 = vpop.permute.xlu1 %4876 }
 0x1c0   : > { %2951 = vmatpush1.msra.mxu0 %v7014_v39  ;;  %2861 = vmatprep.subr.mxu1 %v6955_v8  ;;  %v3523_v8 = vsub.f32 %v3412_v49, %v7046_v53  ;;  %v3979_v35 = vand.u32 4294901760, %v7102_v34  ;;  %v4875_v49 = vpop.permute.xlu0 %4874 }
 0x1c1   : > { %3110 = vmatprep.subr.mxu0 %v3027_v42  ;;  %2742 = vmatprep.mubr.f32.mxu1 %v7424_v1  ;;  %v4880_v5 = vsel %vm4878_vm1, %v4875_v49, %v4877_v55 }
 0x1c2   : > { %2984 = vmatprep.mubr.f32.mxu0 %v7424_v1  ;;  %2746 = vmatmul.mubr.f32.vlgmr.msra.gmra.mxu1 %v2508_v51  ;;  %v3036_v51 = vand.u32 4294901760, %v3035_v6  ;;  %v3980_v50 = vsub.f32 %v7102_v34, %v3979_v35  ;;  %v4884_v60 = vsel %vm1909_vm10, %v4880_v5, 0.0 }
 0x1c3   : > { %2863 = vmatpush1.msra.mxu1 %v6967_v3  ;;  %2990 = vmatmul.mubr.f32.vlgmr.msra.gmra.mxu0 %v2989_v61  ;;  %v3524_v3 = vand.u32 4294901760, %v3523_v8  ;;  %v7148_v61 = vsub.f32 %v4394_v37, %v7134_v15  ;;  %v4894_v45 = vsel %vm938_vm7, %v4884_v60, 0 }
 0x1c4   : > { %3113 = vmatpush1.msra.mxu0 %v3033_v47  ;;  %3031 = vmatprep.subr.mxu1 %v3030_v9  ;;  %v7123_v47 = vsub.f32 %v3905_v32, %v7106_v36  ;;  %v3981_v58 = vand.u32 4294901760, %v3980_v50  ;;  %v4873_v6 = vpop.permute.xlu0 %4872  ;;  %v6460_v9 = vld [vmem:[%s7416_s3 + $0x20] sm:$0xf] }
 0x1c5   : > { %3264 = vmatprep.subr.mxu0 %v3028_v38  ;;  %2896 = vmatprep.mubr.f32.mxu1 %v7424_v1  ;;  %v3525_v59 = vsub.f32 %v3523_v8, %v3524_v3  ;;  %v4391_v38 = vsel %vm4390_vm15, %v4385_v48, %v4387_v28  ;;  %v4469_v43 = vand.u32 4294901760, %v7148_v61  ;;  %v4879_v62 = vsel %vm4878_vm1, %v4873_v6, %v4875_v49 }
 0x1c6   : > { %3146 = vmatprep.mubr.f32.mxu0 %v7424_v1  ;;  %2898 = vmatmul.mubr.f32.vlgmr.msra.gmra.mxu1 %v6950_v57  ;;  %v3530_v57 = vand.u32 4294901760, %v7076_v2 }
 0x1c7   : > { %3037 = vmatpush1.msra.mxu1 %v3036_v51  ;;  %3149 = vmatmul.mubr.f32.vlgmr.msra.gmra.mxu0 %v7007_v33  ;;  %v3526_v42 = vand.u32 4294901760, %v3525_v59 }
 0x1c8   : > { %3268 = vmatpush1.msra.mxu0 %v3034_v22  ;;  %3186 = vmatprep.subr.mxu1 %v7000_v29  ;;  %v3531_v41 = vsub.f32 %v7076_v2, %v3530_v57  ;;  %v4396_v22 = vsel %vm938_vm7, %v4391_v38, 0 }
 0x1c9   : > { %3445 = vmatprep.subr.mxu0 %v7046_v53  ;;  %3070 = vmatprep.mubr.f32.mxu1 %v7424_v1  ;;  %v7152_v4 = vand.u32 4294901760, %v4396_v22 }
 0x1ca   : > { %3301 = vmatprep.mubr.f32.mxu0 %v7424_v1  ;;  %3072 = vmatmul.mubr.f32.vlgmr.msra.gmra.mxu1 %v6992_v26  ;;  %v3532_v33 = vand.u32 4294901760, %v3531_v41 }
 0x1cb   : > { %3188 = vmatpush1.msra.mxu1 %v7014_v39  ;;  %3303 = vmatmul.mubr.f32.vlgmr.msra.gmra.mxu0 %v6992_v26  ;;  %v4515_v51 = vsub.f32 %v4396_v22, %v7152_v4 }
 0x1cc   : > { %3447 = vmatpush1.msra.mxu0 %v7058_v0  ;;  %3340 = vmatprep.subr.mxu1 %v7000_v29  ;;  %v4019_v29 = vsub.f32 %v3908_v19, %v7094_v23 }
 0x1cd   : > { %3606 = vmatprep.subr.mxu0 %v3523_v8  ;;  %3221 = vmatprep.mubr.f32.mxu1 %v7424_v1  ;;  %v4516_v18 = vand.u32 4294901760, %v4515_v51 }
 0x1ce   : > { %3480 = vmatprep.mubr.f32.mxu0 %v7424_v1  ;;  %3225 = vmatmul.mubr.f32.vlgmr.msra.gmra.mxu1 %v2987_v44  ;;  %v4398_v44 = vsel %vm938_vm7, %v4392_v46, 0 }
 0x1cf   : > { %3342 = vmatpush1.msra.mxu1 %v7014_v39  ;;  %3486 = vmatmul.mubr.f32.vlgmr.msra.gmra.mxu0 %v3485_v31  ;;  %v4020_v39 = vand.u32 4294901760, %v4019_v29  ;;  %v7140_v24 = vand.u32 4294901760, %v4398_v44  ;;  %v4517_v59 = vsub.f32 %v4515_v51, %v4516_v18 }
 0x1d0   : > { %3609 = vmatpush1.msra.mxu0 %v7076_v2  ;;  %3527 = vmatprep.subr.mxu1 %v3526_v42  ;;  %v4888_v2 = vsel %vm934_vm3, %v6460_v9, 0 }
 0x1d1   : > { %3760 = vmatprep.subr.mxu0 %v3524_v3  ;;  %3375 = vmatprep.mubr.f32.mxu1 %v7424_v1  ;;  %v4021_v56 = vsub.f32 %v4019_v29, %v4020_v39  ;;  %v4509_v8 = vsub.f32 %v4398_v44, %v7140_v24  ;;  %v4470_v3 = vsub.f32 %v7148_v61, %v4469_v43  ;;  %v7182_v19 = vand.u32 4294901760, %v4888_v2 }
 0x1d2   : > { %3642 = vmatprep.mubr.f32.mxu0 %v7424_v1  ;;  %3377 = vmatmul.mubr.f32.vlgmr.msra.gmra.mxu1 %v6992_v26  ;;  %v4026_v26 = vand.u32 4294901760, %v7123_v47  ;;  %v4518_v30 = vand.u32 4294901760, %v4517_v59 }
 0x1d3   : > { %3533 = vmatpush1.msra.mxu1 %v3532_v33  ;;  %3645 = vmatmul.mubr.f32.vlgmr.msra.gmra.mxu0 %v7054_v63  ;;  %v7195_v32 = vsub.f32 %v4888_v2, %v7182_v19 }
 0x1d4   : > { %3764 = vmatpush1.msra.mxu0 %v3530_v57  ;;  %3682 = vmatprep.subr.mxu1 %v7046_v53  ;;  %v4027_v7 = vsub.f32 %v7123_v47, %v4026_v26  ;;  %v4471_v57 = vand.u32 4294901760, %v4470_v3 }
 0x1d5   : > { %3941 = vmatprep.subr.mxu0 %v7094_v23  ;;  %3566 = vmatprep.mubr.f32.mxu1 %v7424_v1  ;;  %v4965_v41 = vand.u32 4294901760, %v7195_v32 }
 0x1d6   : > { %3797 = vmatprep.mubr.f32.mxu0 %v7424_v1  ;;  %3568 = vmatmul.mubr.f32.vlgmr.msra.gmra.mxu1 %v7041_v40  ;;  %v4028_v63 = vand.u32 4294901760, %v4027_v7 }
 0x1d7   : > { %3684 = vmatpush1.msra.mxu1 %v7058_v0  ;;  %3799 = vmatmul.mubr.f32.vlgmr.msra.gmra.mxu0 %v7041_v40 }
 0x1d8   : > { %3943 = vmatpush1.msra.mxu0 %v7106_v36  ;;  %3836 = vmatprep.subr.mxu1 %v7046_v53  ;;  %v4022_v53 = vand.u32 4294901760, %v4021_v56 }
 0x1d9   : > { %4102 = vmatprep.subr.mxu0 %v4019_v29  ;;  %3717 = vmatprep.mubr.f32.mxu1 %v7424_v1 }
 0x1da   : > { %3976 = vmatprep.mubr.f32.mxu0 %v7424_v1  ;;  %3721 = vmatmul.mubr.f32.vlgmr.msra.gmra.mxu1 %v3483_v12  ;;  %v4883_v12 = vsel %vm1908_vm11, %v4879_v62, 0.0 }
 0x1db   : > { %3838 = vmatpush1.msra.mxu1 %v7058_v0  ;;  %3982 = vmatmul.mubr.f32.vlgmr.msra.gmra.mxu0 %v3981_v58  ;;  %v4510_v0 = vand.u32 4294901760, %v4509_v8  ;;  %v4891_v54 = vsel %vm938_vm7, %v4883_v12, 0 }
 0x1dc   : > { %4105 = vmatpush1.msra.mxu0 %v7123_v47  ;;  %4023 = vmatprep.subr.mxu1 %v4022_v53  ;;  %v7199_v28 = vand.u32 4294901760, %v4891_v54 }
 0x1dd   : > { %4256 = vmatprep.subr.mxu0 %v4020_v39  ;;  %3871 = vmatprep.mubr.f32.mxu1 %v7424_v1  ;;  %v4511_v25 = vsub.f32 %v4509_v8, %v4510_v0 }
 0x1de   : > { %4138 = vmatprep.mubr.f32.mxu0 %v7424_v1  ;;  %3873 = vmatmul.mubr.f32.vlgmr.msra.gmra.mxu1 %v7041_v40  ;;  %v7187_v40 = vand.u32 4294901760, %v4894_v45 }
 0x1df   : > { %4029 = vmatpush1.msra.mxu1 %v4028_v63  ;;  %4141 = vmatmul.mubr.f32.vlgmr.msra.gmra.mxu0 %v7102_v34  ;;  %v4512_v31 = vand.u32 4294901760, %v4511_v25  ;;  %v900_v25 = vpop.permute.xlu1 %899 }
 0x1e0   : > { %4260 = vmatpush1.msra.mxu0 %v4026_v26  ;;  %4178 = vmatprep.subr.mxu1 %v7094_v23  ;;  %v5005_v52 = vsub.f32 %v4894_v45, %v7187_v40 }
 0x1e1   : > { %4431 = vmatprep.subr.mxu0 %v7140_v24  ;;  %4062 = vmatprep.mubr.f32.mxu1 %v7424_v1 }
 0x1e2   : > { %4293 = vmatprep.mubr.f32.mxu0 %v7424_v1  ;;  %4064 = vmatmul.mubr.f32.vlgmr.msra.gmra.mxu1 %v7088_v27  ;;  %v5006_v34 = vand.u32 4294901760, %v5005_v52 }
 0x1e3   : > { %4180 = vmatpush1.msra.mxu1 %v7106_v36  ;;  %4295 = vmatmul.mubr.f32.vlgmr.msra.gmra.mxu0 %v7088_v27 }
 0x1e4   : > { %4433 = vmatpush1.msra.mxu0 %v7152_v4  ;;  %4332 = vmatprep.subr.mxu1 %v7094_v23  ;;  %v5011_v23 = vsub.f32 %v4891_v54, %v7199_v28  ;;  %v5007_v29 = vsub.f32 %v5005_v52, %v5006_v34 }
 0x1e5   : > { %4592 = vmatprep.subr.mxu0 %v4509_v8  ;;  %4213 = vmatprep.mubr.f32.mxu1 %v7424_v1 }
 0x1e6   : > { %4466 = vmatprep.mubr.f32.mxu0 %v7424_v1  ;;  %4217 = vmatmul.mubr.f32.vlgmr.msra.gmra.mxu1 %v3979_v35  ;;  %v5012_v42 = vand.u32 4294901760, %v5011_v23  ;;  %v5008_v46 = vand.u32 4294901760, %v5007_v29 }
 0x1e7   : > { %4334 = vmatpush1.msra.mxu1 %v7106_v36  ;;  %4472 = vmatmul.mubr.f32.vlgmr.msra.gmra.mxu0 %v4471_v57  ;;  %v4966_v36 = vsub.f32 %v7195_v32, %v4965_v41 }
 0x1e8   : > { %4595 = vmatpush1.msra.mxu0 %v4515_v51  ;;  %4513 = vmatprep.subr.mxu1 %v4512_v31  ;;  %v5013_v35 = vsub.f32 %v5011_v23, %v5012_v42 }
 0x1e9   : > { %4746 = vmatprep.subr.mxu0 %v4510_v0  ;;  %4367 = vmatprep.mubr.f32.mxu1 %v7424_v1 }
 0x1ea   : > { %4628 = vmatprep.mubr.f32.mxu0 %v7424_v1  ;;  %4369 = vmatmul.mubr.f32.vlgmr.msra.gmra.mxu1 %v7088_v27  ;;  %v4967_v27 = vand.u32 4294901760, %v4966_v36  ;;  %v5014_v48 = vand.u32 4294901760, %v5013_v35 }
 0x1eb   : > { %4519 = vmatpush1.msra.mxu1 %v4518_v30  ;;  %4631 = vmatmul.mubr.f32.vlgmr.msra.gmra.mxu0 %v7148_v61 }
 0x1ec   : > { %4750 = vmatpush1.msra.mxu0 %v4516_v18  ;;  %4668 = vmatprep.subr.mxu1 %v7140_v24 }
 0x1ed   : > { %4927 = vmatprep.subr.mxu0 %v7187_v40  ;;  %4552 = vmatprep.mubr.f32.mxu1 %v7424_v1 }
 0x1ee   : > { %4783 = vmatprep.mubr.f32.mxu0 %v7424_v1  ;;  %4554 = vmatmul.mubr.f32.vlgmr.msra.gmra.mxu1 %v7134_v15 }
 0x1ef   : > { %4670 = vmatpush1.msra.mxu1 %v7152_v4  ;;  %4785 = vmatmul.mubr.f32.vlgmr.msra.gmra.mxu0 %v7134_v15 }
 0x1f0   : > { %4929 = vmatpush1.msra.mxu0 %v7199_v28  ;;  %4822 = vmatprep.subr.mxu1 %v7140_v24 }
 0x1f1   : > { %5088 = vmatprep.subr.mxu0 %v5005_v52  ;;  %4703 = vmatprep.mubr.f32.mxu1 %v7424_v1 }
 0x1f2   : > { %4962 = vmatprep.mubr.f32.mxu0 %v7424_v1  ;;  %4707 = vmatmul.mubr.f32.vlgmr.msra.gmra.mxu1 %v4469_v43 }
 0x1f3   : > { %4824 = vmatpush1.msra.mxu1 %v7152_v4  ;;  %4968 = vmatmul.mubr.f32.vlgmr.msra.gmra.mxu0 %v4967_v27 }
 0x1f4   : > { %5091 = vmatpush1.msra.mxu0 %v5011_v23  ;;  %5009 = vmatprep.subr.mxu1 %v5008_v46 }
 0x1f5   : > { %5242 = vmatprep.subr.mxu0 %v5006_v34  ;;  %4857 = vmatprep.mubr.f32.mxu1 %v7424_v1 }
 0x1f6   : > { %5124 = vmatprep.mubr.f32.mxu0 %v7424_v1  ;;  %4859 = vmatmul.mubr.f32.vlgmr.msra.gmra.mxu1 %v7134_v15 }
 0x1f7   : > { %5015 = vmatpush1.msra.mxu1 %v5014_v48  ;;  %5127 = vmatmul.mubr.f32.vlgmr.msra.gmra.mxu0 %v7195_v32 }
 0x1f8   : > { %5246 = vmatpush1.msra.mxu0 %v5012_v42  ;;  %5164 = vmatprep.subr.mxu1 %v7187_v40 }
 0x1f9   : > { %5048 = vmatprep.mubr.f32.mxu1 %v7424_v1  ;;  %5279 = vmatprep.mubr.f32.mxu0 %v7424_v1 }
 0x1fa   : > { %5050 = vmatmul.mubr.f32.vlgmr.msra.gmra.mxu1 %v7182_v19 }
 0x1fb   : > { %5166 = vmatpush1.msra.mxu1 %v7199_v28  ;;  %5199 = vmatprep.mubr.f32.mxu1 %v7424_v1 }
 0x1fc   : > { %5318 = vmatprep.subr.mxu1 %v7187_v40  ;;  %5281 = vmatmul.mubr.f32.vlgmr.msra.gmra.mxu0 %v7182_v19 }
 0x1fd   : > { %5452 = vmatprep.mubr.f32.mxu0 %v7424_v1 }
 0x1fe   : > { %5203 = vmatmul.mubr.f32.vlgmr.msra.gmra.mxu1 %v4965_v41 }
 0x1ff   : > { %5320 = vmatpush1.msra.mxu1 %v7199_v28  ;;  %5353 = vmatprep.mubr.f32.mxu1 %v7424_v1 }
 0x202   : > { %5355 = vmatmul.mubr.f32.vlgmr.msra.gmra.mxu1 %v7182_v19 }
 0x203   : > { %5538 = vmatprep.mubr.f32.mxu1 %v7424_v1 }
 0x252   : > { %v1018_v37 = vpop.f32.mrf.mxu0 }
 0x254   : > { %v1020_v47 = vpop.f32.mrf.mxu0 }
 0x256   : > { %v1177_v33 = vpop.f32.mrf.mxu0 }
 0x258   : > { %v1179_v39 = vpop.f32.mrf.mxu0 }
 0x25a   : > { %v1100_v44 = vpop.f32.mrf.mxu1 }
 0x25b   : > { %v1101_v38 = vadd.f32 %v1100_v44, %v1018_v37  ;;  %v1331_v49 = vpop.f32.mrf.mxu0 }
 0x25c   : > { %v1102_v50 = vpop.f32.mrf.mxu1 }
 0x25d   : > { %v1178_v15 = vadd.f32 %v1177_v33, %v1101_v38  ;;  %v1103_v26 = vadd.f32 %v1102_v50, %v1020_v47  ;;  %v1333_v24 = vpop.f32.mrf.mxu0 }
 0x25e   : > { %v1253_v22 = vpop.f32.mrf.mxu1 }
 0x25f   : > { %v1180_v55 = vadd.f32 %v1179_v39, %v1103_v26  ;;  %v1254_v56 = vadd.f32 %v1253_v22, %v1178_v15  ;;  %v1508_v58 = vpop.f32.mrf.mxu0 }
 0x260   : > { %v1255_v61 = vpop.f32.mrf.mxu1 }
 0x261   : > { %v1332_v4 = vadd.f32 %v1331_v49, %v1254_v56  ;;  %v1256_v5 = vadd.f32 %v1255_v61, %v1180_v55  ;;  %v1510_v6 = vpop.f32.mrf.mxu0 }
 0x262   : > { %v1405_v7 = vpop.f32.mrf.mxu1 }
 0x263   : > { %v1334_v9 = vadd.f32 %v1333_v24, %v1256_v5  ;;  %v1406_v8 = vadd.f32 %v1405_v7, %v1332_v4  ;;  %v1667_v53 = vpop.f32.mrf.mxu0 }
 0x264   : > { %v1407_v43 = vpop.f32.mrf.mxu1 }
 0x265   : > { %v1408_v60 = vadd.f32 %v1407_v43, %v1334_v9  ;;  %v1669_v62 = vpop.f32.mrf.mxu0  ;;  %v1410_v52 = vadd.f32 %v1406_v8, %v900_v25 }
 0x266   : > { %v1590_v2 = vpop.f32.mrf.mxu1 }
 0x267   : > { %v1591_v51 = vadd.f32 %v1590_v2, %v1508_v58  ;;  %v1821_v63 = vpop.f32.mrf.mxu0  ;;  %v1411_v36 = vadd.f32 %v1408_v60, %v900_v25 }
 0x268   : > { %v1592_v0 = vpop.f32.mrf.mxu1 }
 0x269   : > { %v1668_v45 = vadd.f32 %v1667_v53, %v1591_v51  ;;  %v1593_v12 = vadd.f32 %v1592_v0, %v1510_v6  ;;  %v1823_v3 = vpop.f32.mrf.mxu0 }
 0x26a   : > { %v1743_v19 = vpop.f32.mrf.mxu1 }
 0x26b   : > { %v1670_v18 = vadd.f32 %v1669_v62, %v1593_v12  ;;  %v1744_v40 = vadd.f32 %v1743_v19, %v1668_v45  ;;  %v2016_v54 = vpop.f32.mrf.mxu0 }
 0x26c   : > { %v1745_v57 = vpop.f32.mrf.mxu1 }
 0x26d   : > { %v1822_v32 = vadd.f32 %v1821_v63, %v1744_v40  ;;  %v1746_v28 = vadd.f32 %v1745_v57, %v1670_v18  ;;  %v7245_v59 = vpop.f32.mrf.mxu0 }
 0x26e   : > { %v1895_v31 = vpop.f32.mrf.mxu1 }
 0x26f   : > { %v1824_v41 = vadd.f32 %v1823_v3, %v1746_v28  ;;  %v1896_v23 = vadd.f32 %v1895_v31, %v1822_v32  ;;  %v2175_v30 = vpop.f32.mrf.mxu0 }
 0x270   : > { %v1897_v34 = vpop.f32.mrf.mxu1 }
 0x271   : > { %v1900_v42 = vadd.f32 %v1896_v23, %v1410_v52  ;;  %v1898_v29 = vadd.f32 %v1897_v34, %v1824_v41  ;;  %v7247_v27 = vpop.f32.mrf.mxu0 }
 0x272   : > { %v2098_v35 = vpop.f32.mrf.mxu1 }
 0x273   : > { %v7249_v46 = vadd.f32 %v1898_v29, %v1411_v36  ;;  %v2099_v48 = vadd.f32 %v2098_v35, %v2016_v54  ;;  %v2329_v37 = vpop.f32.mrf.mxu0 }
 0x274   : > { %v2100_v47 = vpop.f32.mrf.mxu1 }
 0x275   : > { %7449 = vst [vmem:[#allocation17_spill] sm:$0xff] %v7249_v46  ;;  %v2176_v33 = vadd.f32 %v2175_v30, %v2099_v48  ;;  %v7251_v39 = vpop.f32.mrf.mxu0 }
 0x276   : > { %v2251_v44 = vpop.f32.mrf.mxu1 }
 0x277   : > { %v2252_v38 = vadd.f32 %v2251_v44, %v2176_v33  ;;  %v2512_v49 = vpop.f32.mrf.mxu0 }
 0x278   : > { %v7253_v50 = vpop.f32.mrf.mxu1 }
 0x279   : > { %v2330_v15 = vadd.f32 %v2329_v37, %v2252_v38  ;;  %v2514_v26 = vpop.f32.mrf.mxu0 }
 0x27a   : > { %v2403_v24 = vpop.f32.mrf.mxu1 }
 0x27b   : > { %v2404_v22 = vadd.f32 %v2403_v24, %v2330_v15  ;;  %v2671_v55 = vpop.f32.mrf.mxu0  ;;  %v2101_v15 = vadd.f32 %v2100_v47, %v7245_v59 }
 0x27c   : > { %v7255_v56 = vpop.f32.mrf.mxu1 }
 0x27d   : > { %v7257_v58 = vadd.f32 %v2404_v22, %v1900_v42  ;;  %v2673_v61 = vpop.f32.mrf.mxu0  ;;  %v2178_v20 = vadd.f32 %v7247_v27, %v2101_v15 }
 0x27e   : > { %v2594_v4 = vpop.f32.mrf.mxu1 }
 0x27f   : > { %7450 = vst [vmem:[#allocation18_spill] sm:$0xff] %v7257_v58  ;;  %v7259_v5 = vpop.f32.mrf.mxu0  ;;  %v2595_v24 = vadd.f32 %v2594_v4, %v2512_v49  ;;  %v2254_v49 = vadd.f32 %v7253_v50, %v2178_v20 }
 0x280   : > { %v2596_v6 = vpop.f32.mrf.mxu1 }
 0x281   : > { %v7261_v7 = vpop.f32.mrf.mxu0  ;;  %v2597_v17 = vadd.f32 %v2596_v6, %v2514_v26  ;;  %v2672_v13 = vadd.f32 %v2671_v55, %v2595_v24 }
 0x282   : > { %v2747_v9 = vpop.f32.mrf.mxu1 }
 0x283   : > { %v2991_v8 = vpop.f32.mrf.mxu0  ;;  %v2748_v26 = vadd.f32 %v2747_v9, %v2672_v13 }
 0x284   : > { %v2749_v53 = vpop.f32.mrf.mxu1 }
 0x285   : > { %v2993_v43 = vpop.f32.mrf.mxu0 }
 0x286   : > { %v7263_v60 = vpop.f32.mrf.mxu1 }
 0x287   : > { %v3150_v62 = vpop.f32.mrf.mxu0 }
 0x288   : > { %v7265_v2 = vpop.f32.mrf.mxu1 }
 0x289   : > { %v3152_v51 = vpop.f32.mrf.mxu0 }
 0x28a   : > { %v3073_v63 = vpop.f32.mrf.mxu1 }
 0x28b   : > { %v7267_v0 = vpop.f32.mrf.mxu0  ;;  %v3074_v21 = vadd.f32 %v3073_v63, %v2991_v8 }
 0x28c   : > { %v3075_v45 = vpop.f32.mrf.mxu1 }
 0x28d   : > { %v7269_v12 = vpop.f32.mrf.mxu0  ;;  %v3076_v11 = vadd.f32 %v3075_v45, %v2993_v43  ;;  %v3151_v58 = vadd.f32 %v3150_v62, %v3074_v21  ;;  %v2332_v62 = vadd.f32 %v7251_v39, %v2254_v49 }
 0x28e   : > { %v3226_v3 = vpop.f32.mrf.mxu1 }
 0x28f   : > { %v3487_v19 = vpop.f32.mrf.mxu0  ;;  %v3153_v4 = vadd.f32 %v3152_v51, %v3076_v11  ;;  %v3227_v45 = vadd.f32 %v3226_v3, %v3151_v58 }
 0x290   : > { %v3228_v18 = vpop.f32.mrf.mxu1 }
 0x291   : > { %v3489_v40 = vpop.f32.mrf.mxu0  ;;  %v3305_v9 = vadd.f32 %v7267_v0, %v3227_v45 }
 0x292   : > { %v7271_v54 = vpop.f32.mrf.mxu1 }
 0x293   : > { %v3646_v25 = vpop.f32.mrf.mxu0 }
 0x294   : > { %v7273_v57 = vpop.f32.mrf.mxu1 }
 0x295   : > { %7451 = vst [vmem:[#allocation19_spill] sm:$0xff] %v7273_v57  ;;  %v3648_v32 = vpop.f32.mrf.mxu0  ;;  %v2674_v57 = vadd.f32 %v2673_v61, %v2597_v17 }
 0x296   : > { %v3569_v28 = vpop.f32.mrf.mxu1 }
 0x297   : > { %v7275_v31 = vpop.f32.mrf.mxu0  ;;  %v3570_v10 = vadd.f32 %v3569_v28, %v3487_v19  ;;  %v2750_v63 = vadd.f32 %v2749_v53, %v2674_v57 }
 0x298   : > { %v3571_v52 = vpop.f32.mrf.mxu1 }
 0x299   : > { %v7277_v41 = vpop.f32.mrf.mxu0  ;;  %v3647_v6 = vadd.f32 %v3646_v25, %v3570_v10  ;;  %v2406_v25 = vadd.f32 %v7255_v56, %v2332_v62 }
 0x29a   : > { %v3722_v23 = vpop.f32.mrf.mxu1 }
 0x29b   : > { %v3983_v30 = vpop.f32.mrf.mxu0  ;;  %v3723_v20 = vadd.f32 %v3722_v23, %v3647_v6 }
 0x29c   : > { %v3724_v34 = vpop.f32.mrf.mxu1 }
 0x29d   : > { %v3985_v36 = vpop.f32.mrf.mxu0 }
 0x29e   : > { %v7279_v42 = vpop.f32.mrf.mxu1 }
 0x29f   : > { %7452 = vst [vmem:[#allocation20_spill] sm:$0xff] %v7279_v42  ;;  %v4142_v29 = vpop.f32.mrf.mxu0 }
 0x2a0   : > { %v7281_v35 = vpop.f32.mrf.mxu1 }
 0x2a1   : > { %7453 = vst [vmem:[#allocation21_spill] sm:$0xff] %v7281_v35  ;;  %v4144_v48 = vpop.f32.mrf.mxu0 }
 0x2a2   : > { %v4065_v37 = vpop.f32.mrf.mxu1 }
 0x2a3   : > { %v7283_v33 = vpop.f32.mrf.mxu0  ;;  %v4066_v59 = vadd.f32 %v4065_v37, %v3983_v30 }
 0x2a4   : > { %v4067_v44 = vpop.f32.mrf.mxu1 }
 0x2a5   : > { %v7285_v38 = vpop.f32.mrf.mxu0  ;;  %v4068_v27 = vadd.f32 %v4067_v44, %v3985_v36  ;;  %v4143_v17 = vadd.f32 %v4142_v29, %v4066_v59  ;;  %v7457_v44 = vld [vmem:[#allocation19_spill] sm:$0xff] }
 0x2a6   : > { %7454 = vst [vmem:[#allocation22_spill] sm:$0xff] %v7285_v38  ;;  %v4218_v22 = vpop.f32.mrf.mxu1  ;;  %v3572_v38 = vadd.f32 %v3571_v52, %v3489_v40  ;;  %v2826_v40 = vadd.f32 %v7259_v5, %v2748_v26  ;;  %v3229_v52 = vadd.f32 %v3228_v18, %v3153_v4  ;;  %v3801_v18 = vadd.f32 %v7275_v31, %v3723_v20 }
 0x2a7   : > { %v4473_v1 = vpop.f32.mrf.mxu0  ;;  %v4145_v11 = vadd.f32 %v4144_v48, %v4068_v27  ;;  %v4219_v51 = vadd.f32 %v4218_v22, %v4143_v17  ;;  %v7456_v48 = vld [vmem:[#allocation18_spill] sm:$0xff] }
 0x2a8   : > { %v4220_v16 = vpop.f32.mrf.mxu1  ;;  %v3649_v19 = vadd.f32 %v3648_v32, %v3572_v38  ;;  %v2900_v39 = vadd.f32 %v7263_v60, %v2826_v40  ;;  %v3307_v5 = vadd.f32 %v7269_v12, %v3229_v52  ;;  %v7458_v38 = vld [vmem:[#allocation20_spill] sm:$0xff] }
 0x2a9   : > { %v4475_v14 = vpop.f32.mrf.mxu0  ;;  %v4221_v32 = vadd.f32 %v4220_v16, %v4145_v11  ;;  %v4297_v60 = vadd.f32 %v7283_v33, %v4219_v51  ;;  %v3875_v15 = vadd.f32 %v7458_v38, %v3801_v18  ;;  %v7460_v33 = vld [vmem:[#allocation21_spill] sm:$0xff]  ;;  %v7461_v38 = vmov 0.0  }
 0x2aa   : > { %v7289_v35 = vpop.f32.mrf.mxu1  ;;  %v3725_v58 = vadd.f32 %v3724_v34, %v3649_v19  ;;  %v3379_v34 = vadd.f32 %v7271_v54, %v3305_v9  ;;  %v2904_v37 = vadd.f32 %v2900_v39, %v7456_v48  ;;  %v3381_v16 = vadd.f32 %v7457_v44, %v3307_v5 }
 0x2ab   : > { %v4632_v42 = vpop.f32.mrf.mxu0 }
 0x2ac   : > { %v7291_v46 = vpop.f32.mrf.mxu1  ;;  %v3803_v56 = vadd.f32 %v7277_v41, %v3725_v58  ;;  %v3383_v49 = vadd.f32 %v3379_v34, %v2904_v37 }
 0x2ad   : > { %v4634_v47 = vpop.f32.mrf.mxu0  ;;  %v7459_v22 = vld [vmem:[#allocation22_spill] sm:$0xff] }
 0x2ae   : > { %v4555_v8 = vpop.f32.mrf.mxu1  ;;  %v4299_v54 = vadd.f32 %v7459_v22, %v4221_v32  ;;  %v3877_v26 = vadd.f32 %v7460_v33, %v3803_v56  ;;  %v3879_v19 = vadd.f32 %v3875_v15, %v3383_v49  ;;  %v7463_v49 = vld [vmem:[#allocation10_spill] sm:$0xff]  ;;  %v7464_v33 = vld [vmem:[#allocation11_spill] sm:$0xff] }
 0x2af   : > { %v4556_v55 = vadd.f32 %v4555_v8, %v4473_v1  ;;  %v4786_v43 = vpop.f32.mrf.mxu0  ;;  %v2828_v1 = vadd.f32 %v7261_v7, %v2750_v63  ;;  %v5370_v7 = vld [vmem:[%s7418_s5] sm:$0xf]  ;;  %v4371_v8 = vadd.f32 %v7289_v35, %v4297_v60 }
 0x2b0   : > { %v4557_v28 = vpop.f32.mrf.mxu1  ;;  %v5378_v31 = vsel %vm934_vm3, %v5370_v7, 0 }
 0x2b1   : > { %v4558_v21 = vadd.f32 %v4557_v28, %v4475_v14  ;;  %v4788_v61 = vpop.f32.mrf.mxu0  ;;  %v4633_v10 = vadd.f32 %v4632_v42, %v4556_v55  ;;  %v2902_v30 = vadd.f32 %v7265_v2, %v2828_v1  ;;  %v7455_v42 = vld [vmem:[#allocation17_spill] sm:$0xff]  ;;  %v7318_v6 = vand.u32 4294901760, %v5378_v31 }
 0x2b2   : > { %v4708_v13 = vpop.f32.mrf.mxu1  ;;  %v2409_v29 = vadd.f32 %v2406_v25, %v7455_v42  ;;  %v4375_v11 = vadd.f32 %v4371_v8, %v3879_v19  ;;  %v7467_v8 = vld [vmem:[#allocation13_spill] sm:$0xff]  ;;  %v5375_v19 = vpop.permute.xlu0 %5374 }
 0x2b3   : > { %v4969_v50 = vpop.f32.mrf.mxu0  ;;  %v4635_v3 = vadd.f32 %v4634_v47, %v4558_v21  ;;  %v4709_v0 = vadd.f32 %v4708_v13, %v4633_v10  ;;  %v7323_v13 = vsub.f32 %v5378_v31, %v7318_v6 }
 0x2b4   : > { %v4710_v53 = vpop.f32.mrf.mxu1  ;;  %v2905_v47 = vadd.f32 %v2902_v30, %v2409_v29 }
 0x2b5   : > { %v4971_v14 = vpop.f32.mrf.mxu0  ;;  %v4711_v12 = vadd.f32 %v4710_v53, %v4635_v3  ;;  %v4787_v59 = vadd.f32 %v4786_v43, %v4709_v0  ;;  %v4373_v43 = vadd.f32 %v7291_v46, %v4299_v54  ;;  %v5858_v46 = vld [vmem:[%s7420_s7] sm:$0xf]  ;;  %v5365_v3 = vstv %s7316_s11 }
 0x2b6   : > { %v4860_v57 = vpop.f32.mrf.mxu1  ;;  %v3384_v45 = vadd.f32 %v3381_v16, %v2905_v47  ;;  %v5455_v18 = vand.u32 4294901760, %v7323_v13 }
 0x2b7   : > { %v5128_v23 = vpop.f32.mrf.mxu0  ;;  %v4789_v27 = vadd.f32 %v4788_v61, %v4711_v12  ;;  %v4861_v21 = vadd.f32 %v4860_v57, %v4787_v59  ;;  %v5866_v57 = vsel %vm386_vm0, %v5858_v46, 0 }
 0x2b8   : > { %v4862_v36 = vpop.f32.mrf.mxu1  ;;  %v3880_v52 = vadd.f32 %v3877_v26, %v3384_v45  ;;  %v5456_v30 = vsub.f32 %v7323_v13, %v5455_v18  ;;  %v7332_v34 = vand.u32 4294901760, %v5866_v57  ;;  %v7465_v26 = vld [vmem:[#allocation15_spill] sm:$0xff] }
 0x2b9   : > { %v5130_v2 = vpop.f32.mrf.mxu0  ;;  %v4863_v35 = vadd.f32 %v4862_v36, %v4789_v27  ;;  %v4865_v58 = vadd.f32 %v4861_v21, %v4375_v11  ;;  %v7468_v27 = vld [vmem:[#allocation16_spill] sm:$0xff] }
 0x2ba   : > { %v5051_v24 = vpop.f32.mrf.mxu1  ;;  %v4376_v9 = vadd.f32 %v4373_v43, %v3880_v52  ;;  %v5457_v42 = vand.u32 4294901760, %v5456_v30  ;;  %v5936_v48 = vsub.f32 %v5866_v57, %v7332_v34 }
 0x2bb   : > { %v5052_v41 = vadd.f32 %v5051_v24, %v4969_v50 }
 0x2bc   : > { %v5053_v4 = vpop.f32.mrf.mxu1  ;;  %v5282_v17 = vpop.f32.mrf.mxu0  ;;  %v4866_v25 = vadd.f32 %v4863_v35, %v4376_v9  ;;  %v5937_v24 = vand.u32 4294901760, %v5936_v48 }
 0x2bd   : > { %v5129_v55 = vadd.f32 %v5128_v23, %v5052_v41  ;;  %v5054_v63 = vadd.f32 %v5053_v4, %v4971_v14  ;;  %v7462_v41 = vld [vmem:[#allocation9_spill] sm:$0xff]  ;;  %v7466_v4 = vld [vmem:[#allocation12_spill] sm:$0xff] }
 0x2be   : > { %v5204_v28 = vpop.f32.mrf.mxu1  ;;  %v5284_v50 = vpop.f32.mrf.mxu0  ;;  %v5938_v59 = vsub.f32 %v5936_v48, %v5937_v24 }
 0x2bf   : > { %v5131_v62 = vadd.f32 %v5130_v2, %v5054_v63  ;;  %v5205_v40 = vadd.f32 %v5204_v28, %v5129_v55  ;;  %v7469_v55 = vld [vmem:[#allocation14_spill] sm:$0xff] }
 0x2c0   : > { %v5206_v20 = vpop.f32.mrf.mxu1  ;;  %v5939_v47 = vand.u32 4294901760, %v5938_v59 }
 0x2c1   : > { %v5283_v61 = vadd.f32 %v5282_v17, %v5205_v40  ;;  %v5207_v10 = vadd.f32 %v5206_v20, %v5131_v62 }
 0x2c2   : > { %v5356_v1 = vpop.f32.mrf.mxu1 }
 0x2c3   : > { %v5285_v53 = vadd.f32 %v5284_v50, %v5207_v10  ;;  %v5357_v51 = vadd.f32 %v5356_v1, %v5283_v61 }
 0x2c4   : > { %v5358_v14 = vpop.f32.mrf.mxu1 }
 0x2c5   : > { %v5361_v39 = vadd.f32 %v5357_v51, %v4865_v58  ;;  %v5359_v5 = vadd.f32 %v5358_v14, %v5285_v53  ;;  %v5863_v58 = vpop.permute.xlu1 %5862 }
 0x2c7   : > { %vm5363_vm2 = vcmp.ge.f32.partialorder %v5361_v39, 0.0  ;;  %v5366_v7 = vmul.f32 %v5365_v3, %v5361_v39  ;;  %v5362_v32 = vadd.f32 %v5359_v5, %v4866_v25 }
 0x2c9   : > { %v5368_v0 = vsel %vm5363_vm2, %v5361_v39, %v5366_v7  ;;  %vm5364_vm3 = vcmp.ge.f32.partialorder %v5362_v32, 0.0  ;;  %v5367_v23 = vmul.f32 %v5365_v3, %v5362_v32 }
 0x2ca   : > { %v5381_v56 = vsel %vm938_vm7, %v5368_v0, 0 }
 0x2cb   : > { %v5369_v36 = vsel %vm5364_vm3, %v5362_v32, %v5367_v23  ;;  %v5418_v60 = vand.u32 4294901760, %v5381_v56 }
 0x2cc   : > { %v5384_v12 = vsel %vm938_vm7, %v5369_v36, 0 }
 0x2cd   : > { %v5416_v31 = vand.u32 4294901760, %v5384_v12  ;;  %v5501_v29 = vsub.f32 %v5381_v56, %v5418_v60 }
 0x2cf   : > { %5417 = vmatprep.subr.mxu0 %v5416_v31  ;;  %v5495_v37 = vsub.f32 %v5384_v12, %v5416_v31  ;;  %v5502_v44 = vand.u32 4294901760, %v5501_v29  ;;  %v5853_v12 = vstv %s7366_s20  ;;  %s6355_s20 = scalar_lea.sflag [#allocation4], %s364_s26 }
 0x2d0   : > { %5419 = vmatpush1.msra.mxu0 %v5418_v60 }
 0x2d1   : > { %5458 = vmatmul.mubr.f32.vlgmr.msra.gmra.mxu0 %v5457_v42  ;;  %5578 = vmatprep.subr.mxu0 %v5495_v37  ;;  %v5496_v16 = vand.u32 4294901760, %v5495_v37  ;;  %v5503_v15 = vsub.f32 %v5501_v29, %v5502_v44 }
 0x2d2   : > { %5581 = vmatpush1.msra.mxu0 %v5501_v29  ;;  %5614 = vmatprep.mubr.f32.mxu0 %v7461_v38 }
 0x2d3   : > { %5732 = vmatprep.subr.mxu0 %v5496_v16  ;;  %v5497_v2 = vsub.f32 %v5495_v37, %v5496_v16  ;;  %v5504_v54 = vand.u32 4294901760, %v5503_v15  ;;  %v6335_v16 = vstv %s7368_s21  ;;  %s6547_s21 = scalar_lea.vmem %s6370_s30, 128 }
 0x2d4   : > { %p6548_p9 = scmp.ne.s32.totalorder %s6370_s30, %s6547_s21 }
 0x2d5   : > { %5617 = vmatmul.mubr.f32.vlgmr.msra.gmra.mxu0 %v7323_v13  ;;  %v5498_v22 = vand.u32 4294901760, %v5497_v2 }
 0x2d6   : > { %5736 = vmatpush1.msra.mxu0 %v5502_v44  ;;  %5769 = vmatprep.mubr.f32.mxu0 %v7461_v38  ;;  %p6549_p10 = pnand %p6548_p9, %p6718_p5 }
 0x2d7   : > { %5499 = vmatprep.subr.mxu1 %v5498_v22  ;;  %5899 = vmatprep.subr.mxu0 %v7462_v41 }
 0x2d8   : > { %5505 = vmatpush1.msra.mxu1 %v5504_v54  ;;  %p6550_p12 = pneg %p6549_p10 }
 0x2d9   : > { %5540 = vmatmul.mubr.f32.vlgmr.msra.gmra.mxu1 %v7318_v6  ;;  %5654 = vmatprep.subr.mxu1 %v5416_v31 }
 0x2da   : > { %5771 = vmatmul.mubr.f32.vlgmr.msra.gmra.mxu0 %v7318_v6  ;;  %5656 = vmatpush1.msra.mxu1 %v5418_v60 }
 0x2db   : > { %5808 = vmatprep.subr.mxu1 %v5416_v31  ;;  %5689 = vmatprep.mubr.f32.mxu1 %v7461_v38 }
 0x2dc   : > { %5901 = vmatpush1.msra.mxu0 %v7463_v49  ;;  %5934 = vmatprep.mubr.f32.mxu0 %v7461_v38 }
 0x2dd   : > { %5693 = vmatmul.mubr.f32.vlgmr.msra.gmra.mxu1 %v5455_v18  ;;  %6060 = vmatprep.subr.mxu0 %v7464_v33 }
 0x2de   : > { %5810 = vmatpush1.msra.mxu1 %v5418_v60  ;;  %5940 = vmatmul.mubr.f32.vlgmr.msra.gmra.mxu0 %v5939_v47 }
 0x2df   : > { %5843 = vmatprep.mubr.f32.mxu1 %v7461_v38  ;;  %5981 = vmatprep.subr.mxu1 %v7465_v26 }
 0x2e0   : > { %6063 = vmatpush1.msra.mxu0 %v7466_v4  ;;  %6096 = vmatprep.mubr.f32.mxu0 %v7461_v38 }
 0x2e1   : > { %5845 = vmatmul.mubr.f32.vlgmr.msra.gmra.mxu1 %v7318_v6  ;;  %6214 = vmatprep.subr.mxu0 %v7467_v8 }
 0x2e2   : > { %5987 = vmatpush1.msra.mxu1 %v7468_v27  ;;  %6020 = vmatprep.mubr.f32.mxu1 %v7461_v38 }
 0x2e3   : > { %6099 = vmatmul.mubr.f32.vlgmr.msra.gmra.mxu0 %v5936_v48  ;;  %6136 = vmatprep.subr.mxu1 %v7462_v41 }
 0x2e4   : > { %6218 = vmatpush1.msra.mxu0 %v7469_v55  ;;  %6251 = vmatprep.mubr.f32.mxu0 %v7461_v38 }
 0x2e5   : > { %6022 = vmatmul.mubr.f32.vlgmr.msra.gmra.mxu1 %v7332_v34 }
 0x2e6   : > { %6138 = vmatpush1.msra.mxu1 %v7463_v49  ;;  %6171 = vmatprep.mubr.f32.mxu1 %v7461_v38 }
 0x2e7   : > { %6253 = vmatmul.mubr.f32.vlgmr.msra.gmra.mxu0 %v7332_v34  ;;  %6290 = vmatprep.subr.mxu1 %v7462_v41  ;;  %v6344_v41 = vstv %s7370_s25  ;;  %s6624_s25 = smov [#allocation6]  }
 0x2e8   : > { %s6551_s17 = sshll.u32 %s6624_s25, 4  ;;  %s6552_s17 = int_to_ptr.vmem [resolvable:$false] %s6551_s17 }
 0x2e9   : > { %6175 = vmatmul.mubr.f32.vlgmr.msra.gmra.mxu1 %v5937_v24  ;;  %s6553_s27 = scalar_lea.vmem %s6552_s17, 256  ;;  %p6554_p13 = scmp.lt.s32.totalorder %s6370_s30, %s6552_s17 }
 0x2ea   : > { %6292 = vmatpush1.msra.mxu1 %v7463_v49  ;;  %6325 = vmatprep.mubr.f32.mxu1 %v7461_v38  ;;  %p6555_p0 = scmp.lt.s32.totalorder %s6553_s27, %s6547_s21 }
 0x2ec   : > { %p6556_p1 = por %p6555_p0, %p6554_p13 }
 0x2ed   : > { %6327 = vmatmul.mubr.f32.vlgmr.msra.gmra.mxu1 %v7332_v34 }
 0x2ee   : > { %p6557_p2 = pnand %p6556_p1, %p6550_p12 }
 0x391   : > { %v5459_v6 = vpop.f32.mrf.mxu0 }
 0x392   : > { %v5460_v17 = vadd.f32 %v5459_v6, %v5375_v19 }
 0x393   : > { %v5461_v63 = vpop.f32.mrf.mxu0 }
 0x394   : > { %v5462_v21 = vadd.f32 %v5461_v63, %v5375_v19 }
 0x395   : > { %v5618_v45 = vpop.f32.mrf.mxu0 }
 0x397   : > { %v5620_v28 = vpop.f32.mrf.mxu0 }
 0x399   : > { %v5541_v43 = vpop.f32.mrf.mxu1 }
 0x39a   : > { %v5542_v62 = vadd.f32 %v5541_v43, %v5460_v17  ;;  %v5772_v40 = vpop.f32.mrf.mxu0 }
 0x39b   : > { %v5543_v52 = vpop.f32.mrf.mxu1 }
 0x39c   : > { %v5544_v20 = vadd.f32 %v5543_v52, %v5462_v21  ;;  %v5774_v13 = vpop.f32.mrf.mxu0  ;;  %v5619_v35 = vadd.f32 %v5618_v45, %v5542_v62 }
 0x39d   : > { %v5694_v11 = vpop.f32.mrf.mxu1 }
 0x39e   : > { %v5941_v61 = vpop.f32.mrf.mxu0  ;;  %v5621_v50 = vadd.f32 %v5620_v28, %v5544_v20  ;;  %v5695_v53 = vadd.f32 %v5694_v11, %v5619_v35 }
 0x39f   : > { %v5696_v10 = vpop.f32.mrf.mxu1  ;;  %v5942_v3 = vadd.f32 %v5941_v61, %v5863_v58 }
 0x3a0   : > { %v5943_v1 = vpop.f32.mrf.mxu0  ;;  %v5697_v14 = vadd.f32 %v5696_v10, %v5621_v50  ;;  %v5773_v18 = vadd.f32 %v5772_v40, %v5695_v53 }
 0x3a1   : > { %v5846_v9 = vpop.f32.mrf.mxu1  ;;  %v5944_v5 = vadd.f32 %v5943_v1, %v5863_v58 }
 0x3a2   : > { %v5775_v32 = vadd.f32 %v5774_v13, %v5697_v14  ;;  %v5847_v56 = vadd.f32 %v5846_v9, %v5773_v18 }
 0x3a3   : > { %v5848_v51 = vpop.f32.mrf.mxu1  ;;  %v6100_v46 = vpop.f32.mrf.mxu0 }
 0x3a4   : > { %v5849_v42 = vadd.f32 %v5848_v51, %v5775_v32  ;;  %v5854_v38 = vmul.f32 %v5853_v12, %v5847_v56  ;;  %vm5851_vm0 = vcmp.ge.f32.partialorder %v5847_v56, 0.0 }
 0x3a5   : > { %v6023_v25 = vpop.f32.mrf.mxu1  ;;  %v6102_v39 = vpop.f32.mrf.mxu0 }
 0x3a6   : > { %v6024_v57 = vadd.f32 %v6023_v25, %v5942_v3  ;;  %v5855_v22 = vmul.f32 %v5853_v12, %v5849_v42  ;;  %vm5852_vm5 = vcmp.ge.f32.partialorder %v5849_v42, 0.0  ;;  %v5856_v47 = vsel %vm5851_vm0, %v5847_v56, %v5854_v38 }
 0x3a7   : > { %v6025_v7 = vpop.f32.mrf.mxu1  ;;  %v6254_v34 = vpop.f32.mrf.mxu0 }
 0x3a8   : > { %v6026_v0 = vadd.f32 %v6025_v7, %v5944_v5  ;;  %v6101_v23 = vadd.f32 %v6100_v46, %v6024_v57  ;;  %v5857_v4 = vsel %vm5852_vm5, %v5849_v42, %v5855_v22 }
 0x3a9   : > { %v6176_v30 = vpop.f32.mrf.mxu1  ;;  %v6256_v37 = vpop.f32.mrf.mxu0 }
 0x3aa   : > { %v6103_v36 = vadd.f32 %v6102_v39, %v6026_v0  ;;  %v6177_v60 = vadd.f32 %v6176_v30, %v6101_v23 }
 0x3ab   : > { %v6178_v31 = vpop.f32.mrf.mxu1 }
 0x3ac   : > { %v6179_v29 = vadd.f32 %v6178_v31, %v6103_v36  ;;  %v6255_v48 = vadd.f32 %v6254_v34, %v6177_v60 }
 0x3ad   : > { %v6328_v44 = vpop.f32.mrf.mxu1 }
 0x3ae   : > { %v6257_v15 = vadd.f32 %v6256_v37, %v6179_v29  ;;  %v6329_v24 = vadd.f32 %v6328_v44, %v6255_v48 }
 0x3af   : > { %v6330_v2 = vpop.f32.mrf.mxu1 }
 0x3b0   : > { %vm6333_vm4 = vcmp.ge.f32.partialorder %v6329_v24, 0.0  ;;  %v6336_v54 = vmul.f32 %v6335_v16, %v6329_v24  ;;  %v6331_v59 = vadd.f32 %v6330_v2, %v6257_v15 }
 0x3b2   : > { %v6338_v49 = vsel %vm6333_vm4, %v6329_v24, %v6336_v54  ;;  %vm6334_vm6 = vcmp.ge.f32.partialorder %v6331_v59, 0.0  ;;  %v6337_v33 = vmul.f32 %v6335_v16, %v6331_v59 }
 0x3b3   : > { %v6340_v26 = vadd.f32 %v6338_v49, %v5856_v47 }
 0x3b4   : > { %v6339_v8 = vsel %vm6334_vm6, %v6331_v59, %v6337_v33 }
 0x3b5   : > { %v6345_v27 = vmul.f32 %v6344_v41, %v6340_v26  ;;  %v6341_v55 = vadd.f32 %v6339_v8, %v5857_v4  ;;  %vm6342_vm7 = vcmp.ge.f32.partialorder %v6340_v26, 0.0 }
 0x3b7   : > { %v6346_v6 = vmul.f32 %v6344_v41, %v6341_v55  ;;  %vm6343_vm8 = vcmp.ge.f32.partialorder %v6341_v55, 0.0  ;;  %v6347_v63 = vsel %vm6342_vm7, %v6340_v26, %v6345_v27 }
 0x3b9   : > { %v6348_v45 = vsel %vm6343_vm8, %v6341_v55, %v6346_v6 }
 0x3ba   : > { %v6351_v19 = vcombine.low %v6347_v63, %v6348_v45 }
 0x3bc   : > { %6353 = vst [vmem:[%s366_s29] sm:$0xff] %v6351_v19 }
 0x3bd   : > { %6560 = shalt.err (!%p6557_p2)
}
 0x3be   : > { %s6561_s11 = scalar_lea.hbm %s6367_s18, 128  ;;  %s6565_s29 = scalar_lea.hbm %s7423_s10, 256 }
 0x3bf   : > { %p6562_p3 = scmp.ne.s32.totalorder %s6367_s18, %s6561_s11  ;;  %p6566_p8 = scmp.lt.s32.totalorder %s6367_s18, %s7423_s10 }
 0x3c0   : > { %p6567_p11 = scmp.lt.s32.totalorder %s6565_s29, %s6561_s11 }
 0x3c1   : > { %p6563_p4 = pnand %p6562_p3, %p6718_p5 }
 0x3c2   : > { %p6568_p9 = por %p6567_p11, %p6566_p8 }
 0x3c3   : > { %p6564_p7 = pneg %p6563_p4 }
 0x3c5   : > { %p6569_p10 = pnand %p6568_p9, %p6564_p7 }
 0x3c7   : > { %6572 = shalt.err (!%p6569_p10)
}
 0x3c8   : > { %6472 = dma.vmem_to_hbm [thread:$0]  (%p6718_p5), %s6370_s30, 128, %s6367_s18, %s6355_s20  }
 0x3c9 PF: > { %p6484_p12 = scmp.ge.s32.totalorder %s6611_s16, 2  ;;  %s6381_s21 = sand.u32 1, %s6599_s13  }
 0x3ca   : > { %s6382_s25 = scalar_lea.sflag [#allocation4], %s6381_s21 }
 0x3cb   : > { %p6479_p13 = pnand %p6484_p12, %p6722_p6 }
 0x3cd   : > { %p6480_p0 = pneg %p6479_p13 }
 0x3cf   : > { %6594 = dma.done.wait (%p6480_p0), %s6382_s25, 128  }
 0x3d0   : > { %6596 = vsyncadd (%p6480_p0), %s6382_s25, 4294967168  ;;  %p21_p1 = scmp.ge.s32.totalorder %s6705_s19, 4   ;;  %s7470_s13 = smov %s6603_s14 }
 0x3d1   : > { %s7471_s14 = smov %s6607_s15  ;;  %s7472_s15 = smov %s6716_s22 }
 0x3d2   : > { %s7473_s16 = smov %s6705_s19  ;;  %23 = sbr.rel (!%p21_p1) target bundleno = 6 (0x6), region = 108 }
 0x3d7   :  { %6387 = vsyncpa [#allocation4], 1 }
 0x3d8   :  { %6389 = vsyncpa [#allocation4 + $0x1], 1 }
 0x3d9   :  { %6390 = vsyncpa [#allocation5], 1 }
 0x3da   :  { %6392 = vsyncpa [#allocation5 + $0x1], 1 }

</bundles_post_ra>
